<compile_context>
chip_gen: v7x
topology: tpu7x:2x2x1
jax: 0.10.0
libtpu: 0.0.40
codegen_flags: <defaults>
</compile_context>

<pallas_src>
import functools

import jax
import jax.numpy as jnp
from jax.experimental import pallas as pl
from jax.experimental.pallas import tpu as pltpu


def _round_up(x, m):
    return ((x + m - 1) // m) * m


# ----------------------------------------------------------------------------
# Pallas kernels: fused (im2col + matmul + bias-threshold + step [+ scale])
# ----------------------------------------------------------------------------
def _conv_accumulate(x_ref, w_ref, Wq, M_out):
    """9 accumulated dots over the phase-split layout.

    x_ref block: (1, 4, Lp, Cin)  -- phases p=(kh%2)*2+(kw%2), flattened
                 (phase_row * Wq + phase_col) spatial dim, Cin on lanes.
    w_ref block: (9, Cin, Cout)   -- tap t = kh*3 + kw.
    Returns f32 (M_out, Cout) pre-activations; positions m with m % Wq == Wo
    are garbage (extra width column) and are dropped by the consumer.
    """
    cout = w_ref.shape[-1]
    acc = jnp.zeros((M_out, cout), jnp.float32)
    for kh in range(3):
        for kw in range(3):
            p = (kh % 2) * 2 + (kw % 2)
            start = (kh // 2) * Wq + (kw // 2)          # static offsets only
            src = x_ref[0, p, pl.ds(start, M_out), :]   # (M_out, Cin) bf16
            acc = acc + jnp.dot(src, w_ref[kh * 3 + kw],
                                preferred_element_type=jnp.float32)
    return acc


def _conv_step_kernel(x_ref, w_ref, thr_ref, o_ref, *, Wq, M_out):
    """Conv + Step (heaviside: 1.0 where pre-activation > -thr... i.e. y+b>0)."""
    acc = _conv_accumulate(x_ref, w_ref, Wq, M_out)
    o_ref[0] = (acc > thr_ref[...]).astype(o_ref.dtype)   # bf16 0/1 (exact)


def _conv_step_scale_kernel(x_ref, w_ref, thr_ref, scale_ref, o_ref, *, Wq, M_out):
    """Last layer: conv + step fused with the sparse-encoding scale."""
    acc = _conv_accumulate(x_ref, w_ref, Wq, M_out)
    o_ref[0] = jnp.where(acc > thr_ref[...], scale_ref[...], 0.0)


def conv_step(x4, w_taps, thr_row, *, Wq, Ho, scale_k=None):
    """x4: (N, 4, Lp, Cin) bf16 phase-split input; w_taps: (9, Cin, Cout) bf16;
    thr_row: (1, Cout) f32 (= -bias); scale_k: optional (Ho*Wq, Cout) f32.

    Returns (N, Ho*Wq, Cout): bf16 0/1 step activations, or f32 scaled
    encodings when scale_k is given (last layer).
    """
    N, P, Lp, Cin = x4.shape
    T, _, Cout = w_taps.shape
    M_out = Ho * Wq
    fuse = scale_k is not None
    if fuse:
        kernel = functools.partial(_conv_step_scale_kernel, Wq=Wq, M_out=M_out)
        out_dtype = jnp.float32
    else:
        kernel = functools.partial(_conv_step_kernel, Wq=Wq, M_out=M_out)
        out_dtype = jnp.bfloat16

    in_specs = [
        # Whole sample's phases; DMA'd once per grid step (sample).
        pl.BlockSpec((1, P, Lp, Cin), lambda n: (n, 0, 0, 0)),
        # Weights / threshold (and scale) stay resident across the grid.
        pl.BlockSpec((T, Cin, Cout), lambda n: (0, 0, 0)),
        pl.BlockSpec((1, Cout), lambda n: (0, 0)),
    ]
    args = [x4, w_taps, thr_row]
    if fuse:
        in_specs.append(pl.BlockSpec((M_out, Cout), lambda n: (0, 0)))
        args.append(scale_k)

    return pl.pallas_call(
        kernel,
        out_shape=jax.ShapeDtypeStruct((N, M_out, Cout), out_dtype),
        grid=(N,),
        in_specs=in_specs,
        out_specs=pl.BlockSpec((1, M_out, Cout), lambda n: (n, 0, 0)),
        compiler_params=pltpu.CompilerParams(
            dimension_semantics=("parallel",),
            vmem_limit_bytes=32 * 1024 * 1024,
        ),
    )(*args)


# ----------------------------------------------------------------------------
# Plain-JAX glue: phase split (space-to-depth), parameters, forward
# ----------------------------------------------------------------------------
def phase_split(a):
    """NHWC activation -> stride-2 phase layout consumed by the conv kernel.

    a: (N, H, W, C), H and W even.  Returns (N, 4, Lp, C) where phase
    p = (row%2)*2 + (col%2) of the zero-padded (H+2, W+2) map, flattened as
    phase_row*Wq + phase_col, plus one guard row so in-kernel shifted slices
    never read out of bounds.  This is the only per-layer XLA data movement
    (~1x activation size); it also absorbs the previous layer's garbage-column
    drop and any channel padding in the same fused copy.
    """
    N, H, W, C = a.shape
    assert H % 2 == 0 and W % 2 == 0, "phase_split expects even spatial dims"
    Ho, Wo = H // 2, W // 2
    Hq, Wq = Ho + 1, Wo + 1
    xp = jnp.pad(a, ((0, 0), (1, 1), (1, 1), (0, 0)))            # (N, 2Hq, 2Wq, C)
    x4 = xp.reshape(N, Hq, 2, Wq, 2, C).transpose(0, 2, 4, 1, 3, 5)
    x4 = x4.reshape(N, 4, Hq * Wq, C)
    x4 = jnp.pad(x4, ((0, 0), (0, 0), (0, Wq), (0, 0)))          # guard row
    return x4, Ho, Wo, Wq


def orthogonal_rows(key, rows, cols):
    """Deterministic equivalent of torch.nn.init.orthogonal_ on (rows, cols)."""
    a = jax.random.normal(key, (max(rows, cols), min(rows, cols)), jnp.float32)
    q, _ = jnp.linalg.qr(a)
    w = q[:cols, :rows].T if rows <= cols else q[:rows, :cols]
    return w.astype(jnp.float32)


def init_params(key, width, depth, input_size, num_masks=3):
    """Synthetic parameters matching the module's __init__ shapes.

    Conv weights are stored as per-tap matrices (9, Cin_pad, Cout) bf16
    (tap t = kh*3 + kw); Cin is zero-padded to a multiple of 8 (the padded
    channels contribute zero).  Bias is stored negated as the step threshold.
    """
    c, h, w = input_size
    convs = []
    for d in range(depth):
        key, wk, bk = jax.random.split(key, 3)
        cin = c if d == 0 else width
        k_flat = cin * 9
        w2d = orthogonal_rows(wk, width, k_flat)            # (Cout, Cin*9)
        bound = 1.0 / jnp.sqrt(jnp.float32(k_flat))         # PyTorch bias default
        b = jax.random.uniform(bk, (width,), jnp.float32, -bound, bound)
        w_taps = (w2d.reshape(width, cin, 3, 3)
                      .transpose(2, 3, 1, 0)                # (3, 3, Cin, Cout)
                      .reshape(9, cin, width))
        cin_pad = _round_up(cin, 8)
        w_taps = jnp.pad(w_taps, ((0, 0), (0, cin_pad - cin), (0, 0)))
        convs.append((w_taps.astype(jnp.bfloat16),
                      (-b).reshape(1, width)))              # threshold = -bias
        h = (h + 2 * 1 - 3) // 2 + 1
        w = (w + 2 * 1 - 3) // 2 + 1
    flatsize = width * h * w
    key, mk, vk = jax.random.split(key, 3)
    masks = (jax.random.uniform(mk, (num_masks, flatsize)) < 0.5).astype(jnp.float32)
    modulation = jax.random.normal(vk, (flatsize,), jnp.float32)
    return {"convs": convs, "masks": masks, "modulation": modulation,
            "feature_size": (width, h, w)}


def sparse_encoding_net_forward(params, x):
    """Forward pass of SparseEncodingNet.  x: (N, C, H, W) float32 (NCHW)."""
    # Single layout change at the input; everything downstream stays NHWC bf16.
    a = jnp.transpose(x, (0, 2, 3, 1)).astype(jnp.bfloat16)
    convs = params["convs"]

    # Fold mask accumulation + modulation into one scale vector, applied inside
    # the LAST conv kernel:  x -> x * prod_i(1 + mask_i) * modulation.
    # TODO(synk): the reference forward does `x = torch.zeros(x.size())` right
    # after flatten (which would zero the encoding) and uses shape-changing
    # masked_select; we keep the computed features and apply the masks
    # elementwise per sample instead.
    scale = params["modulation"] * jnp.prod(1.0 + params["masks"], axis=0)

    out = None
    for li, (w_taps, thr_row) in enumerate(convs):
        # Pad channels to the weight's (zero-padded) Cin; fused into phase_split.
        pad_c = w_taps.shape[1] - a.shape[-1]
        if pad_c:
            a = jnp.pad(a, ((0, 0), (0, 0), (0, 0), (0, pad_c)))
        # TODO(synk): a fully in-kernel variant would build the phases from the
        # raw NHWC block (sublane-strided reads + in-VMEM zero padding); kept in
        # the wrapper as one space-to-depth pass for lowering robustness.
        x4, Ho, Wo, Wq = phase_split(a)
        Cout = w_taps.shape[-1]
        if li == len(convs) - 1:
            scale_k = jnp.pad(scale.reshape(Ho, Wo, Cout),
                              ((0, 0), (0, 1), (0, 0))).reshape(Ho * Wq, Cout)
            y = conv_step(x4, w_taps, thr_row, Wq=Wq, Ho=Ho, scale_k=scale_k)
            out = (y.reshape(-1, Ho, Wq, Cout)[:, :, :Wo, :]
                     .reshape(-1, Ho * Wo * Cout))          # drop guard col, flatten
        else:
            y = conv_step(x4, w_taps, thr_row, Wq=Wq, Ho=Ho)  # (N, Ho*Wq, Cout) bf16
            a = y.reshape(-1, Ho, Wq, Cout)[:, :, :Wo, :]     # NHWC for next layer
    return out


# ----------------------------------------------------------------------------
# Main
# ----------------------------------------------------------------------------
if __name__ == "__main__":
    key = jax.random.PRNGKey(0)
    key, xk, pk = jax.random.split(key, 3)

    batch = 2
    input_size = (4, 16, 16)   # (C, H, W)
    width = 8
    depth = 2

    x = jax.random.normal(xk, (batch,) + input_size, jnp.float32)
    params = init_params(pk, width, depth, input_size)

    fwd = jax.jit(functools.partial(sparse_encoding_net_forward, params))
    out = fwd(x)
    jax.block_until_ready(out)

    assert out.shape == (batch, params["masks"].shape[1]), out.shape
    assert bool(jnp.all(jnp.isfinite(out)))
    print("KERNEL_OK")
</pallas_src>

<mosaic_0001>
module attributes {stable_mosaic.version = 11 : i64} {
  func.func @_conv_step_kernel(%arg0: i32, %arg1: memref<1x4x90x8xbf16, #tpu.memory_space<vmem>>, %arg2: memref<9x8x8xbf16, #tpu.memory_space<vmem>>, %arg3: memref<1x8xf32, #tpu.memory_space<vmem>>, %arg4: memref<1x72x8xbf16, #tpu.memory_space<vmem>>) attributes {dimension_semantics = [#tpu.dimension_semantics<parallel>], iteration_bounds = array<i64: 2>, scalar_prefetch = 0 : i64, scratch_operands = 0 : i64, tpu.core_type = #tpu.core_type<tc>, window_params = [{transform_indices = @transform_0, window_bounds = array<i64: 1, 4, 90, 8>}, {pipeline_mode = #tpu.pipeline_mode<synchronous>, transform_indices = @transform_1, window_bounds = array<i64: 9, 8, 8>}, {pipeline_mode = #tpu.pipeline_mode<synchronous>, transform_indices = @transform_2, window_bounds = array<i64: 1, 8>}, {transform_indices = @transform_3, window_bounds = array<i64: 1, 72, 8>}]} {
    %cst = arith.constant 0.000000e+00 : f32
    %0 = vector.broadcast %cst : f32 to vector<72x8xf32>
    %c0 = arith.constant 0 : index
    %c0_0 = arith.constant 0 : index
    %c0_1 = arith.constant 0 : index
    %c0_2 = arith.constant 0 : index
    %1 = vector.load %arg1[%c0, %c0_0, %c0_1, %c0_2] : memref<1x4x90x8xbf16, #tpu.memory_space<vmem>>, vector<1x1x72x8xbf16>
    %2 = vector.shape_cast %1 : vector<1x1x72x8xbf16> to vector<72x8xbf16>
    %c0_3 = arith.constant 0 : index
    %c0_4 = arith.constant 0 : index
    %c0_5 = arith.constant 0 : index
    %3 = vector.load %arg2[%c0_3, %c0_4, %c0_5] : memref<9x8x8xbf16, #tpu.memory_space<vmem>>, vector<1x8x8xbf16>
    %4 = vector.shape_cast %3 : vector<1x8x8xbf16> to vector<8x8xbf16>
    %cst_6 = arith.constant dense<0.000000e+00> : vector<72x8xf32>
    %5 = tpu.matmul %2, %4, %cst_6 {dimension_numbers = #tpu.dot_dimension_numbers<[1], [0], [0], [1], [0, 0, 1, 1], [], []>} : vector<72x8xbf16>, vector<8x8xbf16>, vector<72x8xf32> -> vector<72x8xf32>
    %6 = arith.addf %0, %5 : vector<72x8xf32>
    %c0_7 = arith.constant 0 : index
    %c1 = arith.constant 1 : index
    %c0_8 = arith.constant 0 : index
    %c0_9 = arith.constant 0 : index
    %7 = vector.load %arg1[%c0_7, %c1, %c0_8, %c0_9] : memref<1x4x90x8xbf16, #tpu.memory_space<vmem>>, vector<1x1x72x8xbf16>
    %8 = vector.shape_cast %7 : vector<1x1x72x8xbf16> to vector<72x8xbf16>
    %c1_10 = arith.constant 1 : index
    %c0_11 = arith.constant 0 : index
    %c0_12 = arith.constant 0 : index
    %9 = vector.load %arg2[%c1_10, %c0_11, %c0_12] : memref<9x8x8xbf16, #tpu.memory_space<vmem>>, vector<1x8x8xbf16>
    %10 = vector.shape_cast %9 : vector<1x8x8xbf16> to vector<8x8xbf16>
    %cst_13 = arith.constant dense<0.000000e+00> : vector<72x8xf32>
    %11 = tpu.matmul %8, %10, %cst_13 {dimension_numbers = #tpu.dot_dimension_numbers<[1], [0], [0], [1], [0, 0, 1, 1], [], []>} : vector<72x8xbf16>, vector<8x8xbf16>, vector<72x8xf32> -> vector<72x8xf32>
    %12 = arith.addf %6, %11 : vector<72x8xf32>
    %c0_14 = arith.constant 0 : index
    %c0_15 = arith.constant 0 : index
    %c1_16 = arith.constant 1 : index
    %c0_17 = arith.constant 0 : index
    %13 = vector.load %arg1[%c0_14, %c0_15, %c1_16, %c0_17] : memref<1x4x90x8xbf16, #tpu.memory_space<vmem>>, vector<1x1x72x8xbf16>
    %14 = vector.shape_cast %13 : vector<1x1x72x8xbf16> to vector<72x8xbf16>
    %c2 = arith.constant 2 : index
    %c0_18 = arith.constant 0 : index
    %c0_19 = arith.constant 0 : index
    %15 = vector.load %arg2[%c2, %c0_18, %c0_19] : memref<9x8x8xbf16, #tpu.memory_space<vmem>>, vector<1x8x8xbf16>
    %16 = vector.shape_cast %15 : vector<1x8x8xbf16> to vector<8x8xbf16>
    %cst_20 = arith.constant dense<0.000000e+00> : vector<72x8xf32>
    %17 = tpu.matmul %14, %16, %cst_20 {dimension_numbers = #tpu.dot_dimension_numbers<[1], [0], [0], [1], [0, 0, 1, 1], [], []>} : vector<72x8xbf16>, vector<8x8xbf16>, vector<72x8xf32> -> vector<72x8xf32>
    %18 = arith.addf %12, %17 : vector<72x8xf32>
    %c0_21 = arith.constant 0 : index
    %c2_22 = arith.constant 2 : index
    %c0_23 = arith.constant 0 : index
    %c0_24 = arith.constant 0 : index
    %19 = vector.load %arg1[%c0_21, %c2_22, %c0_23, %c0_24] : memref<1x4x90x8xbf16, #tpu.memory_space<vmem>>, vector<1x1x72x8xbf16>
    %20 = vector.shape_cast %19 : vector<1x1x72x8xbf16> to vector<72x8xbf16>
    %c3 = arith.constant 3 : index
    %c0_25 = arith.constant 0 : index
    %c0_26 = arith.constant 0 : index
    %21 = vector.load %arg2[%c3, %c0_25, %c0_26] : memref<9x8x8xbf16, #tpu.memory_space<vmem>>, vector<1x8x8xbf16>
    %22 = vector.shape_cast %21 : vector<1x8x8xbf16> to vector<8x8xbf16>
    %cst_27 = arith.constant dense<0.000000e+00> : vector<72x8xf32>
    %23 = tpu.matmul %20, %22, %cst_27 {dimension_numbers = #tpu.dot_dimension_numbers<[1], [0], [0], [1], [0, 0, 1, 1], [], []>} : vector<72x8xbf16>, vector<8x8xbf16>, vector<72x8xf32> -> vector<72x8xf32>
    %24 = arith.addf %18, %23 : vector<72x8xf32>
    %c0_28 = arith.constant 0 : index
    %c3_29 = arith.constant 3 : index
    %c0_30 = arith.constant 0 : index
    %c0_31 = arith.constant 0 : index
    %25 = vector.load %arg1[%c0_28, %c3_29, %c0_30, %c0_31] : memref<1x4x90x8xbf16, #tpu.memory_space<vmem>>, vector<1x1x72x8xbf16>
    %26 = vector.shape_cast %25 : vector<1x1x72x8xbf16> to vector<72x8xbf16>
    %c4 = arith.constant 4 : index
    %c0_32 = arith.constant 0 : index
    %c0_33 = arith.constant 0 : index
    %27 = vector.load %arg2[%c4, %c0_32, %c0_33] : memref<9x8x8xbf16, #tpu.memory_space<vmem>>, vector<1x8x8xbf16>
    %28 = vector.shape_cast %27 : vector<1x8x8xbf16> to vector<8x8xbf16>
    %cst_34 = arith.constant dense<0.000000e+00> : vector<72x8xf32>
    %29 = tpu.matmul %26, %28, %cst_34 {dimension_numbers = #tpu.dot_dimension_numbers<[1], [0], [0], [1], [0, 0, 1, 1], [], []>} : vector<72x8xbf16>, vector<8x8xbf16>, vector<72x8xf32> -> vector<72x8xf32>
    %30 = arith.addf %24, %29 : vector<72x8xf32>
    %c0_35 = arith.constant 0 : index
    %c2_36 = arith.constant 2 : index
    %c1_37 = arith.constant 1 : index
    %c0_38 = arith.constant 0 : index
    %31 = vector.load %arg1[%c0_35, %c2_36, %c1_37, %c0_38] : memref<1x4x90x8xbf16, #tpu.memory_space<vmem>>, vector<1x1x72x8xbf16>
    %32 = vector.shape_cast %31 : vector<1x1x72x8xbf16> to vector<72x8xbf16>
    %c5 = arith.constant 5 : index
    %c0_39 = arith.constant 0 : index
    %c0_40 = arith.constant 0 : index
    %33 = vector.load %arg2[%c5, %c0_39, %c0_40] : memref<9x8x8xbf16, #tpu.memory_space<vmem>>, vector<1x8x8xbf16>
    %34 = vector.shape_cast %33 : vector<1x8x8xbf16> to vector<8x8xbf16>
    %cst_41 = arith.constant dense<0.000000e+00> : vector<72x8xf32>
    %35 = tpu.matmul %32, %34, %cst_41 {dimension_numbers = #tpu.dot_dimension_numbers<[1], [0], [0], [1], [0, 0, 1, 1], [], []>} : vector<72x8xbf16>, vector<8x8xbf16>, vector<72x8xf32> -> vector<72x8xf32>
    %36 = arith.addf %30, %35 : vector<72x8xf32>
    %c0_42 = arith.constant 0 : index
    %c0_43 = arith.constant 0 : index
    %c9 = arith.constant 9 : index
    %c0_44 = arith.constant 0 : index
    %37 = vector.load %arg1[%c0_42, %c0_43, %c9, %c0_44] : memref<1x4x90x8xbf16, #tpu.memory_space<vmem>>, vector<1x1x72x8xbf16>
    %38 = vector.shape_cast %37 : vector<1x1x72x8xbf16> to vector<72x8xbf16>
    %c6 = arith.constant 6 : index
    %c0_45 = arith.constant 0 : index
    %c0_46 = arith.constant 0 : index
    %39 = vector.load %arg2[%c6, %c0_45, %c0_46] : memref<9x8x8xbf16, #tpu.memory_space<vmem>>, vector<1x8x8xbf16>
    %40 = vector.shape_cast %39 : vector<1x8x8xbf16> to vector<8x8xbf16>
    %cst_47 = arith.constant dense<0.000000e+00> : vector<72x8xf32>
    %41 = tpu.matmul %38, %40, %cst_47 {dimension_numbers = #tpu.dot_dimension_numbers<[1], [0], [0], [1], [0, 0, 1, 1], [], []>} : vector<72x8xbf16>, vector<8x8xbf16>, vector<72x8xf32> -> vector<72x8xf32>
    %42 = arith.addf %36, %41 : vector<72x8xf32>
    %c0_48 = arith.constant 0 : index
    %c1_49 = arith.constant 1 : index
    %c9_50 = arith.constant 9 : index
    %c0_51 = arith.constant 0 : index
    %43 = vector.load %arg1[%c0_48, %c1_49, %c9_50, %c0_51] : memref<1x4x90x8xbf16, #tpu.memory_space<vmem>>, vector<1x1x72x8xbf16>
    %44 = vector.shape_cast %43 : vector<1x1x72x8xbf16> to vector<72x8xbf16>
    %c7 = arith.constant 7 : index
    %c0_52 = arith.constant 0 : index
    %c0_53 = arith.constant 0 : index
    %45 = vector.load %arg2[%c7, %c0_52, %c0_53] : memref<9x8x8xbf16, #tpu.memory_space<vmem>>, vector<1x8x8xbf16>
    %46 = vector.shape_cast %45 : vector<1x8x8xbf16> to vector<8x8xbf16>
    %cst_54 = arith.constant dense<0.000000e+00> : vector<72x8xf32>
    %47 = tpu.matmul %44, %46, %cst_54 {dimension_numbers = #tpu.dot_dimension_numbers<[1], [0], [0], [1], [0, 0, 1, 1], [], []>} : vector<72x8xbf16>, vector<8x8xbf16>, vector<72x8xf32> -> vector<72x8xf32>
    %48 = arith.addf %42, %47 : vector<72x8xf32>
    %c0_55 = arith.constant 0 : index
    %c0_56 = arith.constant 0 : index
    %c10 = arith.constant 10 : index
    %c0_57 = arith.constant 0 : index
    %49 = vector.load %arg1[%c0_55, %c0_56, %c10, %c0_57] : memref<1x4x90x8xbf16, #tpu.memory_space<vmem>>, vector<1x1x72x8xbf16>
    %50 = vector.shape_cast %49 : vector<1x1x72x8xbf16> to vector<72x8xbf16>
    %c8 = arith.constant 8 : index
    %c0_58 = arith.constant 0 : index
    %c0_59 = arith.constant 0 : index
    %51 = vector.load %arg2[%c8, %c0_58, %c0_59] : memref<9x8x8xbf16, #tpu.memory_space<vmem>>, vector<1x8x8xbf16>
    %52 = vector.shape_cast %51 : vector<1x8x8xbf16> to vector<8x8xbf16>
    %cst_60 = arith.constant dense<0.000000e+00> : vector<72x8xf32>
    %53 = tpu.matmul %50, %52, %cst_60 {dimension_numbers = #tpu.dot_dimension_numbers<[1], [0], [0], [1], [0, 0, 1, 1], [], []>} : vector<72x8xbf16>, vector<8x8xbf16>, vector<72x8xf32> -> vector<72x8xf32>
    %54 = arith.addf %48, %53 : vector<72x8xf32>
    %c0_61 = arith.constant 0 : index
    %c0_62 = arith.constant 0 : index
    %55 = vector.load %arg3[%c0_61, %c0_62] : memref<1x8xf32, #tpu.memory_space<vmem>>, vector<1x8xf32>
    %56 = vector.broadcast %55 : vector<1x8xf32> to vector<72x8xf32>
    %57 = arith.cmpf ogt, %54, %56 : vector<72x8xf32>
    %58 = arith.extui %57 : vector<72x8xi1> to vector<72x8xi32>
    %59 = arith.sitofp %58 : vector<72x8xi32> to vector<72x8xf32>
    %60 = arith.truncf %59 : vector<72x8xf32> to vector<72x8xbf16>
    %c0_63 = arith.constant 0 : index
    %c0_64 = arith.constant 0 : index
    %c0_65 = arith.constant 0 : index
    %61 = vector.load %arg4[%c0_63, %c0_64, %c0_65] : memref<1x72x8xbf16, #tpu.memory_space<vmem>>, vector<1x72x8xbf16>
    %62 = vector.shape_cast %61 : vector<1x72x8xbf16> to vector<72x8xbf16>
    %63 = vector.shape_cast %60 : vector<72x8xbf16> to vector<1x72x8xbf16>
    tpu.vector_store %arg4[%c0_63, %c0_64, %c0_65], %63 {strides = array<i32>} : memref<1x72x8xbf16, #tpu.memory_space<vmem>>, vector<1x72x8xbf16>,
    return
  }
  func.func @transform_0(%arg0: i32) -> (i32, i32, i32, i32) {
    %c0_i32 = arith.constant 0 : i32
    %c0_i32_0 = arith.constant 0 : i32
    %c0_i32_1 = arith.constant 0 : i32
    %c0_i32_2 = arith.constant 0 : i32
    return %arg0, %c0_i32, %c0_i32_0, %c0_i32_1 : i32, i32, i32, i32
  }
  func.func @transform_1(%arg0: i32) -> (i32, i32, i32) {
    %c0_i32 = arith.constant 0 : i32
    %c0_i32_0 = arith.constant 0 : i32
    %c0_i32_1 = arith.constant 0 : i32
    %c0_i32_2 = arith.constant 0 : i32
    return %c0_i32, %c0_i32_0, %c0_i32_1 : i32, i32, i32
  }
  func.func @transform_2(%arg0: i32) -> (i32, i32) {
    %c0_i32 = arith.constant 0 : i32
    %c0_i32_0 = arith.constant 0 : i32
    %c0_i32_1 = arith.constant 0 : i32
    return %c0_i32, %c0_i32_0 : i32, i32
  }
  func.func @transform_3(%arg0: i32) -> (i32, i32, i32) {
    %c0_i32 = arith.constant 0 : i32
    %c0_i32_0 = arith.constant 0 : i32
    %c0_i32_1 = arith.constant 0 : i32
    return %arg0, %c0_i32, %c0_i32_0 : i32, i32, i32
  }
}

module attributes {stable_mosaic.version = 11 : i64} {
  func.func @_conv_step_scale_kernel(%arg0: i32, %arg1: memref<1x4x30x8xbf16, #tpu.memory_space<vmem>>, %arg2: memref<9x8x8xbf16, #tpu.memory_space<vmem>>, %arg3: memref<1x8xf32, #tpu.memory_space<vmem>>, %arg4: memref<20x8xf32, #tpu.memory_space<vmem>>, %arg5: memref<1x20x8xf32, #tpu.memory_space<vmem>>) attributes {dimension_semantics = [#tpu.dimension_semantics<parallel>], iteration_bounds = array<i64: 2>, scalar_prefetch = 0 : i64, scratch_operands = 0 : i64, tpu.core_type = #tpu.core_type<tc>, window_params = [{transform_indices = @transform_0, window_bounds = array<i64: 1, 4, 30, 8>}, {pipeline_mode = #tpu.pipeline_mode<synchronous>, transform_indices = @transform_1, window_bounds = array<i64: 9, 8, 8>}, {pipeline_mode = #tpu.pipeline_mode<synchronous>, transform_indices = @transform_2, window_bounds = array<i64: 1, 8>}, {pipeline_mode = #tpu.pipeline_mode<synchronous>, transform_indices = @transform_3, window_bounds = array<i64: 20, 8>}, {transform_indices = @transform_4, window_bounds = array<i64: 1, 20, 8>}]} {
    %cst = arith.constant 0.000000e+00 : f32
    %0 = vector.broadcast %cst : f32 to vector<20x8xf32>
    %c0 = arith.constant 0 : index
    %c0_0 = arith.constant 0 : index
    %c0_1 = arith.constant 0 : index
    %c0_2 = arith.constant 0 : index
    %1 = vector.load %arg1[%c0, %c0_0, %c0_1, %c0_2] : memref<1x4x30x8xbf16, #tpu.memory_space<vmem>>, vector<1x1x20x8xbf16>
    %2 = vector.shape_cast %1 : vector<1x1x20x8xbf16> to vector<20x8xbf16>
    %c0_3 = arith.constant 0 : index
    %c0_4 = arith.constant 0 : index
    %c0_5 = arith.constant 0 : index
    %3 = vector.load %arg2[%c0_3, %c0_4, %c0_5] : memref<9x8x8xbf16, #tpu.memory_space<vmem>>, vector<1x8x8xbf16>
    %4 = vector.shape_cast %3 : vector<1x8x8xbf16> to vector<8x8xbf16>
    %cst_6 = arith.constant dense<0.000000e+00> : vector<20x8xf32>
    %5 = tpu.matmul %2, %4, %cst_6 {dimension_numbers = #tpu.dot_dimension_numbers<[1], [0], [0], [1], [0, 0, 1, 1], [], []>} : vector<20x8xbf16>, vector<8x8xbf16>, vector<20x8xf32> -> vector<20x8xf32>
    %6 = arith.addf %0, %5 : vector<20x8xf32>
    %c0_7 = arith.constant 0 : index
    %c1 = arith.constant 1 : index
    %c0_8 = arith.constant 0 : index
    %c0_9 = arith.constant 0 : index
    %7 = vector.load %arg1[%c0_7, %c1, %c0_8, %c0_9] : memref<1x4x30x8xbf16, #tpu.memory_space<vmem>>, vector<1x1x20x8xbf16>
    %8 = vector.shape_cast %7 : vector<1x1x20x8xbf16> to vector<20x8xbf16>
    %c1_10 = arith.constant 1 : index
    %c0_11 = arith.constant 0 : index
    %c0_12 = arith.constant 0 : index
    %9 = vector.load %arg2[%c1_10, %c0_11, %c0_12] : memref<9x8x8xbf16, #tpu.memory_space<vmem>>, vector<1x8x8xbf16>
    %10 = vector.shape_cast %9 : vector<1x8x8xbf16> to vector<8x8xbf16>
    %cst_13 = arith.constant dense<0.000000e+00> : vector<20x8xf32>
    %11 = tpu.matmul %8, %10, %cst_13 {dimension_numbers = #tpu.dot_dimension_numbers<[1], [0], [0], [1], [0, 0, 1, 1], [], []>} : vector<20x8xbf16>, vector<8x8xbf16>, vector<20x8xf32> -> vector<20x8xf32>
    %12 = arith.addf %6, %11 : vector<20x8xf32>
    %c0_14 = arith.constant 0 : index
    %c0_15 = arith.constant 0 : index
    %c1_16 = arith.constant 1 : index
    %c0_17 = arith.constant 0 : index
    %13 = vector.load %arg1[%c0_14, %c0_15, %c1_16, %c0_17] : memref<1x4x30x8xbf16, #tpu.memory_space<vmem>>, vector<1x1x20x8xbf16>
    %14 = vector.shape_cast %13 : vector<1x1x20x8xbf16> to vector<20x8xbf16>
    %c2 = arith.constant 2 : index
    %c0_18 = arith.constant 0 : index
    %c0_19 = arith.constant 0 : index
    %15 = vector.load %arg2[%c2, %c0_18, %c0_19] : memref<9x8x8xbf16, #tpu.memory_space<vmem>>, vector<1x8x8xbf16>
    %16 = vector.shape_cast %15 : vector<1x8x8xbf16> to vector<8x8xbf16>
    %cst_20 = arith.constant dense<0.000000e+00> : vector<20x8xf32>
    %17 = tpu.matmul %14, %16, %cst_20 {dimension_numbers = #tpu.dot_dimension_numbers<[1], [0], [0], [1], [0, 0, 1, 1], [], []>} : vector<20x8xbf16>, vector<8x8xbf16>, vector<20x8xf32> -> vector<20x8xf32>
    %18 = arith.addf %12, %17 : vector<20x8xf32>
    %c0_21 = arith.constant 0 : index
    %c2_22 = arith.constant 2 : index
    %c0_23 = arith.constant 0 : index
    %c0_24 = arith.constant 0 : index
    %19 = vector.load %arg1[%c0_21, %c2_22, %c0_23, %c0_24] : memref<1x4x30x8xbf16, #tpu.memory_space<vmem>>, vector<1x1x20x8xbf16>
    %20 = vector.shape_cast %19 : vector<1x1x20x8xbf16> to vector<20x8xbf16>
    %c3 = arith.constant 3 : index
    %c0_25 = arith.constant 0 : index
    %c0_26 = arith.constant 0 : index
    %21 = vector.load %arg2[%c3, %c0_25, %c0_26] : memref<9x8x8xbf16, #tpu.memory_space<vmem>>, vector<1x8x8xbf16>
    %22 = vector.shape_cast %21 : vector<1x8x8xbf16> to vector<8x8xbf16>
    %cst_27 = arith.constant dense<0.000000e+00> : vector<20x8xf32>
    %23 = tpu.matmul %20, %22, %cst_27 {dimension_numbers = #tpu.dot_dimension_numbers<[1], [0], [0], [1], [0, 0, 1, 1], [], []>} : vector<20x8xbf16>, vector<8x8xbf16>, vector<20x8xf32> -> vector<20x8xf32>
    %24 = arith.addf %18, %23 : vector<20x8xf32>
    %c0_28 = arith.constant 0 : index
    %c3_29 = arith.constant 3 : index
    %c0_30 = arith.constant 0 : index
    %c0_31 = arith.constant 0 : index
    %25 = vector.load %arg1[%c0_28, %c3_29, %c0_30, %c0_31] : memref<1x4x30x8xbf16, #tpu.memory_space<vmem>>, vector<1x1x20x8xbf16>
    %26 = vector.shape_cast %25 : vector<1x1x20x8xbf16> to vector<20x8xbf16>
    %c4 = arith.constant 4 : index
    %c0_32 = arith.constant 0 : index
    %c0_33 = arith.constant 0 : index
    %27 = vector.load %arg2[%c4, %c0_32, %c0_33] : memref<9x8x8xbf16, #tpu.memory_space<vmem>>, vector<1x8x8xbf16>
    %28 = vector.shape_cast %27 : vector<1x8x8xbf16> to vector<8x8xbf16>
    %cst_34 = arith.constant dense<0.000000e+00> : vector<20x8xf32>
    %29 = tpu.matmul %26, %28, %cst_34 {dimension_numbers = #tpu.dot_dimension_numbers<[1], [0], [0], [1], [0, 0, 1, 1], [], []>} : vector<20x8xbf16>, vector<8x8xbf16>, vector<20x8xf32> -> vector<20x8xf32>
    %30 = arith.addf %24, %29 : vector<20x8xf32>
    %c0_35 = arith.constant 0 : index
    %c2_36 = arith.constant 2 : index
    %c1_37 = arith.constant 1 : index
    %c0_38 = arith.constant 0 : index
    %31 = vector.load %arg1[%c0_35, %c2_36, %c1_37, %c0_38] : memref<1x4x30x8xbf16, #tpu.memory_space<vmem>>, vector<1x1x20x8xbf16>
    %32 = vector.shape_cast %31 : vector<1x1x20x8xbf16> to vector<20x8xbf16>
    %c5 = arith.constant 5 : index
    %c0_39 = arith.constant 0 : index
    %c0_40 = arith.constant 0 : index
    %33 = vector.load %arg2[%c5, %c0_39, %c0_40] : memref<9x8x8xbf16, #tpu.memory_space<vmem>>, vector<1x8x8xbf16>
    %34 = vector.shape_cast %33 : vector<1x8x8xbf16> to vector<8x8xbf16>
    %cst_41 = arith.constant dense<0.000000e+00> : vector<20x8xf32>
    %35 = tpu.matmul %32, %34, %cst_41 {dimension_numbers = #tpu.dot_dimension_numbers<[1], [0], [0], [1], [0, 0, 1, 1], [], []>} : vector<20x8xbf16>, vector<8x8xbf16>, vector<20x8xf32> -> vector<20x8xf32>
    %36 = arith.addf %30, %35 : vector<20x8xf32>
    %c0_42 = arith.constant 0 : index
    %c0_43 = arith.constant 0 : index
    %c5_44 = arith.constant 5 : index
    %c0_45 = arith.constant 0 : index
    %37 = vector.load %arg1[%c0_42, %c0_43, %c5_44, %c0_45] : memref<1x4x30x8xbf16, #tpu.memory_space<vmem>>, vector<1x1x20x8xbf16>
    %38 = vector.shape_cast %37 : vector<1x1x20x8xbf16> to vector<20x8xbf16>
    %c6 = arith.constant 6 : index
    %c0_46 = arith.constant 0 : index
    %c0_47 = arith.constant 0 : index
    %39 = vector.load %arg2[%c6, %c0_46, %c0_47] : memref<9x8x8xbf16, #tpu.memory_space<vmem>>, vector<1x8x8xbf16>
    %40 = vector.shape_cast %39 : vector<1x8x8xbf16> to vector<8x8xbf16>
    %cst_48 = arith.constant dense<0.000000e+00> : vector<20x8xf32>
    %41 = tpu.matmul %38, %40, %cst_48 {dimension_numbers = #tpu.dot_dimension_numbers<[1], [0], [0], [1], [0, 0, 1, 1], [], []>} : vector<20x8xbf16>, vector<8x8xbf16>, vector<20x8xf32> -> vector<20x8xf32>
    %42 = arith.addf %36, %41 : vector<20x8xf32>
    %c0_49 = arith.constant 0 : index
    %c1_50 = arith.constant 1 : index
    %c5_51 = arith.constant 5 : index
    %c0_52 = arith.constant 0 : index
    %43 = vector.load %arg1[%c0_49, %c1_50, %c5_51, %c0_52] : memref<1x4x30x8xbf16, #tpu.memory_space<vmem>>, vector<1x1x20x8xbf16>
    %44 = vector.shape_cast %43 : vector<1x1x20x8xbf16> to vector<20x8xbf16>
    %c7 = arith.constant 7 : index
    %c0_53 = arith.constant 0 : index
    %c0_54 = arith.constant 0 : index
    %45 = vector.load %arg2[%c7, %c0_53, %c0_54] : memref<9x8x8xbf16, #tpu.memory_space<vmem>>, vector<1x8x8xbf16>
    %46 = vector.shape_cast %45 : vector<1x8x8xbf16> to vector<8x8xbf16>
    %cst_55 = arith.constant dense<0.000000e+00> : vector<20x8xf32>
    %47 = tpu.matmul %44, %46, %cst_55 {dimension_numbers = #tpu.dot_dimension_numbers<[1], [0], [0], [1], [0, 0, 1, 1], [], []>} : vector<20x8xbf16>, vector<8x8xbf16>, vector<20x8xf32> -> vector<20x8xf32>
    %48 = arith.addf %42, %47 : vector<20x8xf32>
    %c0_56 = arith.constant 0 : index
    %c0_57 = arith.constant 0 : index
    %c6_58 = arith.constant 6 : index
    %c0_59 = arith.constant 0 : index
    %49 = vector.load %arg1[%c0_56, %c0_57, %c6_58, %c0_59] : memref<1x4x30x8xbf16, #tpu.memory_space<vmem>>, vector<1x1x20x8xbf16>
    %50 = vector.shape_cast %49 : vector<1x1x20x8xbf16> to vector<20x8xbf16>
    %c8 = arith.constant 8 : index
    %c0_60 = arith.constant 0 : index
    %c0_61 = arith.constant 0 : index
    %51 = vector.load %arg2[%c8, %c0_60, %c0_61] : memref<9x8x8xbf16, #tpu.memory_space<vmem>>, vector<1x8x8xbf16>
    %52 = vector.shape_cast %51 : vector<1x8x8xbf16> to vector<8x8xbf16>
    %cst_62 = arith.constant dense<0.000000e+00> : vector<20x8xf32>
    %53 = tpu.matmul %50, %52, %cst_62 {dimension_numbers = #tpu.dot_dimension_numbers<[1], [0], [0], [1], [0, 0, 1, 1], [], []>} : vector<20x8xbf16>, vector<8x8xbf16>, vector<20x8xf32> -> vector<20x8xf32>
    %54 = arith.addf %48, %53 : vector<20x8xf32>
    %c0_63 = arith.constant 0 : index
    %c0_64 = arith.constant 0 : index
    %55 = vector.load %arg3[%c0_63, %c0_64] : memref<1x8xf32, #tpu.memory_space<vmem>>, vector<1x8xf32>
    %56 = vector.broadcast %55 : vector<1x8xf32> to vector<20x8xf32>
    %57 = arith.cmpf ogt, %54, %56 : vector<20x8xf32>
    %c0_65 = arith.constant 0 : index
    %c0_66 = arith.constant 0 : index
    %58 = vector.load %arg4[%c0_65, %c0_66] : memref<20x8xf32, #tpu.memory_space<vmem>>, vector<20x8xf32>
    %cst_67 = arith.constant 0.000000e+00 : f32
    %59 = vector.broadcast %cst_67 : f32 to vector<20x8xf32>
    %60 = arith.select %57, %58, %59 : vector<20x8xi1>, vector<20x8xf32>
    %c0_68 = arith.constant 0 : index
    %c0_69 = arith.constant 0 : index
    %c0_70 = arith.constant 0 : index
    %61 = vector.load %arg5[%c0_68, %c0_69, %c0_70] : memref<1x20x8xf32, #tpu.memory_space<vmem>>, vector<1x20x8xf32>
    %62 = vector.shape_cast %61 : vector<1x20x8xf32> to vector<20x8xf32>
    %63 = vector.shape_cast %60 : vector<20x8xf32> to vector<1x20x8xf32>
    tpu.vector_store %arg5[%c0_68, %c0_69, %c0_70], %63 {strides = array<i32>} : memref<1x20x8xf32, #tpu.memory_space<vmem>>, vector<1x20x8xf32>,
    return
  }
  func.func @transform_0(%arg0: i32) -> (i32, i32, i32, i32) {
    %c0_i32 = arith.constant 0 : i32
    %c0_i32_0 = arith.constant 0 : i32
    %c0_i32_1 = arith.constant 0 : i32
    %c0_i32_2 = arith.constant 0 : i32
    return %arg0, %c0_i32, %c0_i32_0, %c0_i32_1 : i32, i32, i32, i32
  }
  func.func @transform_1(%arg0: i32) -> (i32, i32, i32) {
    %c0_i32 = arith.constant 0 : i32
    %c0_i32_0 = arith.constant 0 : i32
    %c0_i32_1 = arith.constant 0 : i32
    %c0_i32_2 = arith.constant 0 : i32
    return %c0_i32, %c0_i32_0, %c0_i32_1 : i32, i32, i32
  }
  func.func @transform_2(%arg0: i32) -> (i32, i32) {
    %c0_i32 = arith.constant 0 : i32
    %c0_i32_0 = arith.constant 0 : i32
    %c0_i32_1 = arith.constant 0 : i32
    return %c0_i32, %c0_i32_0 : i32, i32
  }
  func.func @transform_3(%arg0: i32) -> (i32, i32) {
    %c0_i32 = arith.constant 0 : i32
    %c0_i32_0 = arith.constant 0 : i32
    %c0_i32_1 = arith.constant 0 : i32
    return %c0_i32, %c0_i32_0 : i32, i32
  }
  func.func @transform_4(%arg0: i32) -> (i32, i32, i32) {
    %c0_i32 = arith.constant 0 : i32
    %c0_i32_0 = arith.constant 0 : i32
    %c0_i32_1 = arith.constant 0 : i32
    return %arg0, %c0_i32, %c0_i32_0 : i32, i32, i32
  }
}

</mosaic_0001>

<bundles_post_ra>
// kernel: sparse_encoding_net_forward.3
= control target key start
LH: loop header
LB: loop body
LE: loop exit
PB: predicated region body
PF: predicated region fallthrough
CT: control target
= control target key end

     0   :  { %s1227_s15 = smov 0   ;;  %s1361_s0 = inlined_call_operand.vmem [shape: bf16[2,4,30,8], index: 0, kind: input, shape index: {}]   ;;  %s1362_s1 = inlined_call_operand.vmem [shape: bf16[9,8,8], index: 1, kind: input, shape index: {}]   ;;  %s1363_s2 = inlined_call_operand.vmem [shape: f32[1,8], index: 2, kind: input, shape index: {}]   ;;  %s1364_s3 = inlined_call_operand.vmem [shape: f32[20,8], index: 3, kind: input, shape index: {}]   ;;  %s1365_s4 = inlined_call_operand.vmem [shape: f32[2,20,8], index: 4, kind: output, shape index: {}]  }
   0x1 LB: > { %s982_s16 = sadd.s32 4294967295, %s1200_s15   ;;  %p986_p0 = scmp.ge.s32.totalorder %s1200_s15, 1  ;;  %s1200_s15 = sphi %s1227_s15, %s14_s15  }
   0x2   : > { %p162_p1 = scmp.lt.s32.totalorder %s1200_s15, 3 }
   0x4   : > { %p163_p2 = pnand %p986_p0, %p162_p1 }
   0x5   : > { %vm224_vm0 = vcmask (!%p163_p2), 1043456   ;;  %v1017_v0 = vld [vmem:[%s1362_s1 + $0x10] sm:$0xf] (!%p163_p2)  ;;  %v993_v1 = vld [vmem:[%s1362_s1 + $0x4] sm:$0xf] (!%p163_p2)  ;;  %p188_p3 = scmp.lt.s32.totalorder (!%p163_p2), %s982_s16, 1 }
   0x6   : > { %166 = sbr.rel (%p163_p2) target bundleno = 287 (0x11f), region = 36  ;;  %1165 = vmatprep.subr.msk.bf16.mxu0 (!%p163_p2), %vm224_vm0, %v1017_v0  ;;  %1161 = vmatprep.subr.msk.bf16.mxu1 (!%p163_p2), %vm224_vm0, %v993_v1  ;;  %v517_v2 = vsel (!%p163_p2), %vm224_vm0, %v1017_v0, 0  ;;  %v226_v3 = vsel (!%p163_p2), %vm224_vm0, %v993_v1, 0  ;;  %v1023_v4 = vld [vmem:[%s1362_s1 + $0x14] sm:$0xf] (!%p163_p2)  ;;  %vm217_vm1 = vcmask (!%p163_p2), 64512  }
   0x7   : > { %1101 = vmatpush3.bf16.msra.mxu0 (!%p163_p2), %v517_v2  ;;  %1077 = vmatpush3.bf16.msra.mxu1 (!%p163_p2), %v226_v3  ;;  %v202_v5 = vld [vmem:[%s1362_s1] sm:$0xf] (!%p163_p2)  ;;  %v597_v7 = vsel (!%p163_p2), %vm224_vm0, %v1023_v4, 0  ;;  %vm347_vm2 = vsmask.f32 (!%p163_p2), 7424  ;;  %vm843_vm4 = vcmask (!%p163_p2), 1044480  }
   0x8   : > { %1166 = vmatprep.subr.msk.bf16.mxu0 (!%p163_p2), %vm224_vm0, %v1023_v4  ;;  %1162 = vmatprep.subr.msk.bf16.mxu1 (!%p163_p2), %vm224_vm0, %v202_v5  ;;  %v291_v9 = vsel (!%p163_p2), %vm224_vm0, %v202_v5, 0  ;;  %v1027_v12 = vld [vmem:[%s1362_s1 + $0x18] sm:$0xf] (!%p163_p2)  ;;  %v1002_v13 = vld [vmem:[%s1362_s1 + $0x8] sm:$0xf] (!%p163_p2)  ;;  %vm925_vm5 = vcmask (!%p163_p2), 60416  }
   0x9   : > { %v691_v20 = vsel (!%p163_p2), %vm224_vm0, %v1027_v12, 0  ;;  %v369_v31 = vsel (!%p163_p2), %vm224_vm0, %v1002_v13, 0  ;;  %vm666_vm3 = vsmask.f32 (!%p163_p2), 5376  ;;  %v1036_v51 = vld [vmem:[%s1362_s1 + $0x1c] sm:$0xf] (!%p163_p2) }
   0xa   : > { %v1009_v52 = vld [vmem:[%s1362_s1 + $0xc] sm:$0xf] (!%p163_p2)  ;;  %v784_v5 = vsel (!%p163_p2), %vm224_vm0, %v1036_v51, 0 }
   0xb   : > { %v443_v4 = vsel (!%p163_p2), %vm224_vm0, %v1009_v52, 0 }
   0xd   : > { %s1367_s16 = smov (!%p188_p3, %s982_s16), 1 }
   0xe   : > { %s1048_s25 = sshll.u32 %s1367_s16, 6  ;;  %s1170_s13 = smul.u32 24, %s1367_s16 }
   0xf   : > { %s1259_s28 = scalar_lea.vmem %s1361_s0, %s1048_s25 }
  0x10   : > { %v1179_v6 = vld [vmem:[%s1259_s28 + $0x10] sm:$0xff]   ;;  %v1181_v10 = vld [vmem:[%s1259_s28 + $0x18] ss:$0 sps:$4 sm:$0x33]   ;;  %v1183_v11 = vld [vmem:[%s1259_s28] sm:$0xff]   ;;  %s197_s22 = scalar_lea.vmem %s1365_s4, %s1170_s13 }
  0x11   : > { %v1180_v8 = vld [vmem:[%s1259_s28 + $0x30] sm:$0xff]   ;;  %1078 = vmatprep.mubr.msk.bf16.mxu1 %vm217_vm1, %v1179_v6  ;;  %v1182_v14 = vld [vmem:[%s1259_s28 + $0x38] ss:$0 sps:$4 sm:$0x33]   ;;  %v1277_v15 = vld [vmem:[%s1259_s28 + $0x20] sm:$0xff]   ;;  %v348_v21 = vshrl.u32 %v1183_v11, 16 }
  0x12   : > { %1102 = vmatprep.mubr.msk.bf16.mxu0 %vm217_vm1, %v1180_v8  ;;  %1079 = vmatmul.mubr.msk.bf16.vlgmr.msra.gmra.mrb[0].mxu1 %vm217_vm1, %v1181_v10  ;;  %v576_v16 = vshrl.u32 %v1277_v15, 16  ;;  %v578_v17 = vshll.u32 %v1277_v15, 16  ;;  %v1185_v18 = vld [vmem:[%s1259_s28 + $0x28] ss:$0 sps:$4 sm:$0x77]   ;;  %v350_v25 = vshll.u32 %v1183_v11, 16 }
  0x13   : > { %1103 = vmatmul.mubr.msk.bf16.vlgmr.msra.gmra.mrb[0].mxu0 %vm217_vm1, %v1182_v14  ;;  %1083 = vmatpush3.bf16.msra.mxu1 %v291_v9  ;;  %v583_v22 = vshll.u32 %v1185_v18, 16  ;;  %v587_v23 = vshrl.u32 %v1185_v18, 16  ;;  %v1187_v24 = vld [vmem:[%s1259_s28 + $0x8] ss:$0 sps:$4 sm:$0x77]  }
  0x14   : > { %1107 = vmatpush3.bf16.msra.mxu0 %v597_v7  ;;  %1084 = vmatprep.mubr.msk.bf16.mxu1 %vm217_vm1, %v1183_v11  ;;  %v580_v19 = vrot.slane %v578_v17, 1  ;;  %v650_v27 = vld [vmem:[%s1259_s28] sm:$0xc]  ;;  %v1291_v28 = vld [vmem:[%s1259_s28 + $0x4] sm:$0xf]  ;;  %v352_v32 = vrot.slane %v350_v25, 1 }
  0x15   : > { %1167 = vmatprep.subr.msk.bf16.mxu0 %vm224_vm0, %v1027_v12  ;;  %1163 = vmatprep.subr.msk.bf16.mxu1 %vm224_vm0, %v1002_v13  ;;  %v585_v29 = vrot.slane %v583_v22, 1  ;;  %v1186_v30 = vld [vmem:[%s1259_s28 + $0x8] ss:$0 sps:$4 sm:$0x33]   ;;  %v355_v33 = vshll.u32 %v1187_v24, 16  ;;  %v1028_v34 = vcombine.low %v650_v27, %v1291_v28  ;;  %v359_v59 = vshrl.u32 %v1187_v24, 16 }
  0x16   : > { %v581_v26 = vor.u32 %v580_v19, %v576_v16  ;;  %v1297_v35 = vld [vmem:[%s1259_s28 + $0x8] sm:$0x1f]   ;;  %v353_v38 = vor.u32 %v352_v32, %v348_v21  ;;  %v1190_v44 = vld [vmem:[%s1259_s28 + $0x10] sm:$0xfc]   ;;  %v1191_v46 = vld [vmem:[%s1259_s28 + $0x18] sm:$0x1f]  }
  0x17   : > { %v589_v37 = vor.u32 %v587_v23, %v585_v29  ;;  %v357_v39 = vrot.slane %v355_v33, 1  ;;  %v668_v40 = vshrl.u32 %v1028_v34, 16  ;;  %v671_v41 = vshll.u32 %v1028_v34, 16  ;;  %v1041_v7 = vld [vmem:[%s1362_s1 + $0x20] sm:$0xf] }
  0x18   : > { %v586_v36 = vsel %vm347_vm2, %v581_v26, %v585_v29  ;;  %v676_v42 = vshrl.u32 %v1297_v35, 16  ;;  %v679_v43 = vshll.u32 %v1297_v35, 16  ;;  %v761_v53 = vshrl.u32 %v1190_v44, 16  ;;  %v837_v8 = vld [vmem:[%s1259_s28] sm:$0x8] }
  0x19   : > { %1108 = vmatprep.mubr.msk.bf16.mxu0 %vm217_vm1, %v586_v36  ;;  %v358_v45 = vsel %vm347_vm2, %v353_v38, %v357_v39  ;;  %v670_v47 = vrot.slane %v668_v40, 2  ;;  %v673_v48 = vrot.slane %v671_v41, 3  ;;  %v764_v54 = vshll.u32 %v1190_v44, 16  ;;  %v1192_v12 = vld [vmem:[%s1259_s28 + $0x28] ss:$0 sps:$4 sm:$0x33]  }
  0x1a   : > { %v678_v49 = vrot.slane %v676_v42, 2  ;;  %v681_v50 = vrot.slane %v679_v43, 3  ;;  %v769_v55 = vshrl.u32 %v1191_v46, 16  ;;  %v772_v56 = vshll.u32 %v1191_v46, 16  ;;  %v919_v22 = vld [vmem:[%s1364_s3 + $0x10] sm:$0xf] }
  0x1b   : > { %v674_v57 = vor.u32 %v673_v48, %v670_v47  ;;  %v763_v61 = vrot.slane %v761_v53, 2  ;;  %v766_v62 = vrot.slane %v764_v54, 3  ;;  %v361_v1 = vor.u32 %v359_v59, %v357_v39  ;;  %v917_v25 = vld [vmem:[%s1364_s3] sm:$0xff] }
  0x1c   : > { %v682_v58 = vor.u32 %v681_v50, %v678_v49  ;;  %v771_v63 = vrot.slane %v769_v55, 2  ;;  %v774_v0 = vrot.slane %v772_v56, 3  ;;  %v1042_v9 = vcombine.low %v837_v8, %v1291_v28 }
  0x1d   : > { %v767_v2 = vor.u32 %v766_v62, %v763_v61  ;;  %v845_v11 = vrot.slane %v1297_v35, 3  ;;  %v854_v13 = vsel %vm224_vm0, %v1041_v7, 0 }
  0x1e   : > { %1085 = vmatmul.mubr.msk.bf16.vlgmr.msra.gmra.mrb[0].mxu1 %vm217_vm1, %v1186_v30  ;;  %v683_v60 = vsel %vm666_vm3, %v674_v57, %v682_v58  ;;  %v775_v3 = vor.u32 %v774_v0, %v771_v63  ;;  %v844_v10 = vrot.slane %v1042_v9, 3  ;;  %v918_v30 = vld [vmem:[%s1364_s3 + $0x8] sm:$0xff] }
  0x1f   : > { %1109 = vmatmul.mubr.msk.bf16.vlgmr.msra.gmra.mrb[0].mxu0 %vm217_vm1, %v589_v37  ;;  %1089 = vmatpush3.bf16.msra.mxu1 %v369_v31 }
  0x20   : > { %1113 = vmatpush3.bf16.msra.mxu0 %v691_v20  ;;  %1090 = vmatprep.mubr.msk.bf16.mxu1 %vm217_vm1, %v358_v45  ;;  %v776_v6 = vsel %vm666_vm3, %v767_v2, %v775_v3  ;;  %v846_v14 = vsel %vm843_vm4, %v844_v10, %v845_v11  ;;  %v1045_v20 = vld [vmem:[%s1363_s2] ss:$0 sm:$0xff] }
  0x21   : > { %1168 = vmatprep.subr.msk.bf16.mxu0 %vm224_vm0, %v1036_v51  ;;  %1164 = vmatprep.subr.msk.bf16.mxu1 %vm224_vm0, %v1009_v52 }
  0x22   : > { %1114 = vmatprep.mubr.msk.bf16.mxu0 %vm217_vm1, %v683_v60 }
  0x2a   : > { %1091 = vmatmul.mubr.msk.bf16.vlgmr.msra.gmra.mrb[0].mxu1 %vm217_vm1, %v361_v1 }
  0x2b   : > { %1115 = vmatmul.mubr.msk.bf16.vlgmr.msra.gmra.mrb[0].mxu0 %vm217_vm1, %v682_v58  ;;  %1095 = vmatpush3.bf16.msra.mxu1 %v443_v4 }
  0x2c   : > { %1119 = vmatpush3.bf16.msra.mxu0 %v784_v5  ;;  %1096 = vmatprep.mubr.msk.bf16.mxu1 %vm217_vm1, %v1277_v15 }
  0x2d   : > { %1120 = vmatprep.mubr.msk.bf16.mxu0 %vm217_vm1, %v776_v6  ;;  %1169 = vmatprep.subr.msk.bf16.mxu0 %vm224_vm0, %v1041_v7 }
  0x36   : > { %1097 = vmatmul.mubr.msk.bf16.vlgmr.msra.gmra.mrb[0].mxu1 %vm217_vm1, %v1192_v12 }
  0x37   : > { %1121 = vmatmul.mubr.msk.bf16.vlgmr.msra.gmra.mrb[0].mxu0 %vm217_vm1, %v775_v3 }
  0x38   : > { %1125 = vmatpush3.bf16.msra.mxu0 %v854_v13  ;;  %1126 = vmatprep.mubr.msk.bf16.mxu0 %vm217_vm1, %v846_v14 }
  0x43   : > { %1127 = vmatmul.mubr.msk.bf16.vlgmr.msra.gmra.mrb[0].mxu0 %vm217_vm1, %v845_v11 }
 0x109   : > { %v1098_v15 = vpop.f32.mrb[0].mxu1 }
 0x10a   : > { %v479_v16 = vpop.f32.mrb[1].mxu1 }
 0x10b   : > { %v1099_v17 = vpop.f32.mrb[2].mxu1 }
 0x10c   : > { %v482_v18 = vpop.f32.mrb[3].mxu1 }
 0x116   : > { %v1128_v19 = vpop.f32.mrb[0].mxu0 }
 0x117   : > { %v1130_v21 = vadd.f32 %v1128_v19, %v1098_v15  ;;  %v890_v23 = vpop.f32.mrb[1].mxu0 }
 0x118   : > { %v1131_v24 = vadd.f32 %v890_v23, %v479_v16  ;;  %v1129_v26 = vpop.f32.mrb[2].mxu0 }
 0x119   : > { %vm916_vm6 = vcmp.gt.f32.partialorder %v1130_v21, %v1045_v20  ;;  %v893_v27 = vpop.f32.mrb[3].mxu0 }
 0x11a   : > { %v922_v28 = vsel %vm916_vm6, %v919_v22, 0.0  ;;  %vm914_vm7 = vcmp.gt.f32.partialorder %v1131_v24, %v1045_v20  ;;  %v1132_v29 = vadd.f32 %v893_v27, %v482_v18 }
 0x11b   : > { %926 = vst.msk [vmem:[%s197_s22 + $0x10] sm:$0xf] %vm925_vm5, %v922_v28  ;;  %v920_v31 = vsel %vm914_vm7, %v917_v25, 0.0 }
 0x11c   : > { %923 = vst.msk [vmem:[%s197_s22] sm:$0xff] %vm217_vm1, %v920_v31  ;;  %vm915_vm8 = vcmp.gt.f32.partialorder %v1132_v29, %v1045_v20 }
 0x11d   : > { %v921_v32 = vsel %vm915_vm8, %v918_v30, 0.0 }
 0x11e   : > { %924 = vst.msk [vmem:[%s197_s22 + $0x8] sm:$0xff] %vm217_vm1, %v921_v32 }
 0x11f PF: > { %s14_s15 = sadd.s32 1, %s1200_s15  }
 0x120   : > { %p11_p4 = scmp.ge.s32.totalorder %s14_s15, 4  }
 0x122   :  { %13 = sbr.rel (!%p11_p4) target bundleno = 1 (0x1), region = 77 }

// kernel: sparse_encoding_net_forward.2
= control target key start
LH: loop header
LB: loop body
LE: loop exit
PB: predicated region body
PF: predicated region fallthrough
CT: control target
= control target key end

     0   :  { %s2306_s12 = smov 0   ;;  %s2708_s0 = inlined_call_operand.vmem [shape: bf16[2,4,90,8], index: 0, kind: input, shape index: {}]   ;;  %s2709_s1 = inlined_call_operand.vmem [shape: bf16[9,8,8], index: 1, kind: input, shape index: {}]   ;;  %s2710_s2 = inlined_call_operand.vmem [shape: f32[1,8], index: 2, kind: input, shape index: {}]   ;;  %s2711_s3 = inlined_call_operand.vmem [shape: bf16[2,72,8], index: 3, kind: output, shape index: {}]  }
   0x1 LB: > { %s1642_s13 = sadd.s32 4294967295, %s2282_s12   ;;  %p1646_p0 = scmp.ge.s32.totalorder %s2282_s12, 1  ;;  %s2282_s12 = sphi %s2306_s12, %s13_s12  }
   0x2   : > { %p137_p1 = scmp.lt.s32.totalorder %s2282_s12, 3 }
   0x4   : > { %p138_p2 = pnand %p1646_p0, %p137_p1 }
   0x5   : > { %vm233_vm0 = vcmask (!%p138_p2), 1043456   ;;  %v1719_v0 = vld [vmem:[%s2709_s1 + $0x10] sm:$0xf] (!%p138_p2)  ;;  %v1658_v1 = vld [vmem:[%s2709_s1 + $0x4] sm:$0xf] (!%p138_p2)  ;;  %v2284_v2 = vmov (!%p138_p2), 0.0  }
   0x6   : > { %141 = sbr.rel (%p138_p2) target bundleno = 414 (0x19e), region = 32  ;;  %1962 = vmatprep.subr.bf16.mxu0 (!%p138_p2), %v2284_v2  ;;  %1874 = vmatprep.subr.bf16.mxu1 (!%p138_p2), %v2284_v2  ;;  %v2323_v3 = vsel (!%p138_p2), %vm233_vm0, %v1719_v0, 0  ;;  %v235_v4 = vsel (!%p138_p2), %vm233_vm0, %v1658_v1, 0  ;;  %p161_p3 = scmp.lt.s32.totalorder (!%p138_p2), %s1642_s13, 1  ;;  %vm2285_vm1 = vmmov (!%p138_p2), 0   ;;  %vm217_vm2 = vcmask (!%p138_p2), 64512  }
   0x7   : > { %1963 = vmatpush3.bf16.msra.mxu0 (!%p138_p2), %v2323_v3  ;;  %1875 = vmatpush3.bf16.msra.mxu1 (!%p138_p2), %v235_v4  ;;  %v1740_v5 = vld [vmem:[%s2709_s1 + $0x14] sm:$0xf] (!%p138_p2)  ;;  %v181_v6 = vld [vmem:[%s2709_s1] sm:$0xf] (!%p138_p2)  ;;  %vm459_vm3 = vsmask.f32 (!%p138_p2), 7424 }
   0x8   : > { %1876 = vmatprep.mubr.msk.bf16.mxu1 (!%p138_p2), %vm2285_vm1, %v2284_v2  ;;  %1964 = vmatprep.mubr.msk.bf16.mxu0 (!%p138_p2), %vm2285_vm1, %v2284_v2  ;;  %v958_v9 = vsel (!%p138_p2), %vm233_vm0, %v1740_v5, 0  ;;  %v348_v10 = vsel (!%p138_p2), %vm233_vm0, %v181_v6, 0  ;;  %v1751_v24 = vld [vmem:[%s2709_s1 + $0x18] sm:$0xf] (!%p138_p2)  ;;  %vm1397_vm4 = vcmask (!%p138_p2), 1046528   ;;  %vm1577_vm6 = vcmask (!%p138_p2), 60416  }
   0x9   : > { %1984 = vmatprep.subr.bf16.mxu0 (!%p138_p2), %v2284_v2  ;;  %1896 = vmatprep.subr.bf16.mxu1 (!%p138_p2), %v2284_v2  ;;  %v1133_v29 = vsel (!%p138_p2), %vm233_vm0, %v1751_v24, 0 }
   0xd   : > { %s2713_s13 = smov (!%p161_p3, %s1642_s13), 1 }
   0xe   : > { %s2223_s18 = smul.u32 192, %s2713_s13 }
   0xf   : > { %s2224_s9 = smul.u32 36, %s2713_s13 }
  0x10   : > { %s2342_s23 = scalar_lea.vmem %s2708_s0, %s2223_s18 }
  0x11   : > { %v2235_v7 = vld [vmem:[%s2342_s23 + $0x30] sm:$0xff]   ;;  %v2237_v11 = vld [vmem:[%s2342_s23 + $0x38] sm:$0xff]   ;;  %v2242_v13 = vld [vmem:[%s2342_s23 + $0x60] sm:$0xff]   ;;  %s2668_s16 = scalar_lea.vmem %s2711_s3, %s2224_s9 }
  0x12   : > { %v2236_v8 = vld [vmem:[%s2342_s23 + $0x90] sm:$0xff]   ;;  %1877 = vmatmul.mubr.msk.bf16.vlgmr.msra.gmra.mrb[0].mxu1 %vm217_vm2, %v2235_v7  ;;  %v2238_v12 = vld [vmem:[%s2342_s23 + $0x98] sm:$0xff]   ;;  %v2243_v14 = vld [vmem:[%s2342_s23 + $0x68] sm:$0xff]   ;;  %v906_v15 = vshll.u32 %v2242_v13, 16  ;;  %v904_v18 = vshrl.u32 %v2242_v13, 16 }
  0x13   : > { %1965 = vmatmul.mubr.msk.bf16.vlgmr.msra.gmra.mrb[0].mxu0 %vm217_vm2, %v2236_v8  ;;  %1880 = vmatprep.mubr.msk.bf16.mxu1 %vm2285_vm1, %v2284_v2  ;;  %v2239_v16 = vld [vmem:[%s2342_s23 + $0x40] sm:$0xff]   ;;  %v911_v20 = vshll.u32 %v2243_v14, 16  ;;  %v2245_v21 = vld [vmem:[%s2342_s23 + $0x70] sm:$0xff]   ;;  %v2241_v25 = vld [vmem:[%s2342_s23 + $0x48] sm:$0xff]   ;;  %v915_v28 = vshrl.u32 %v2243_v14, 16 }
  0x14   : > { %1985 = vmatpush3.bf16.msra.mxu0 %v958_v9  ;;  %1968 = vmatprep.mubr.msk.bf16.mxu0 %vm2285_vm1, %v2284_v2  ;;  %v2240_v17 = vld [vmem:[%s2342_s23 + $0xa0] sm:$0xff]   ;;  %v908_v19 = vrot.slane %v906_v15, 1  ;;  %v919_v26 = vshll.u32 %v2245_v21, 16  ;;  %v2385_v30 = vld [vmem:[%s2342_s23 + $0x78] sm:$0xff]   ;;  %v923_v32 = vshrl.u32 %v2245_v21, 16  ;;  %v2259_v33 = vld [vmem:[%s2342_s23 + $0x10] sm:$0xff]  }
  0x15   : > { %1897 = vmatpush3.bf16.msra.mxu1 %v348_v10  ;;  %2006 = vmatprep.subr.bf16.mxu0 %v2284_v2  ;;  %v913_v23 = vrot.slane %v911_v20, 1  ;;  %v2388_v31 = vld [vmem:[%s2342_s23 + $0x1c] sm:$0xff]   ;;  %v2244_v37 = vld [vmem:[%s2342_s23 + $0x50] ss:$0 sps:$4 sm:$0xff]   ;;  %v476_v39 = vshll.u32 %v2259_v33, 16  ;;  %v480_v43 = vshrl.u32 %v2259_v33, 16 }
  0x16   : > { %1918 = vmatprep.subr.bf16.mxu1 %v2284_v2  ;;  %v909_v22 = vor.u32 %v908_v19, %v904_v18  ;;  %v2261_v34 = vld [vmem:[%s2342_s23 + $0x18] sm:$0xff]   ;;  %v921_v35 = vrot.slane %v919_v26, 1  ;;  %v1102_v36 = vshll.u32 %v2388_v31, 16  ;;  %v2401_v40 = vld [vmem:[%s2342_s23 + $0x24] sm:$0x1f]   ;;  %v1106_v41 = vshrl.u32 %v2388_v31, 16 }
  0x17   : > { %v917_v38 = vor.u32 %v915_v28, %v913_v23  ;;  %v484_v44 = vshll.u32 %v2261_v34, 16  ;;  %v2263_v45 = vld [vmem:[%s2342_s23 + $0x34] sm:$0xff]   ;;  %v927_v46 = vshll.u32 %v2385_v30, 16  ;;  %v2409_v47 = vrot.slane %v476_v39, 1  ;;  %v2264_v49 = vld [vmem:[%s2342_s23 + $0x3c] sm:$0xff]   ;;  %v2265_v4 = vld [vmem:[%s2342_s23 + $0x44] sm:$0xff]  }
  0x18   : > { %v914_v27 = vsel %vm459_vm3, %v909_v22, %v913_v23  ;;  %v2405_v42 = vrot.slane %v1102_v36, 1  ;;  %v1110_v48 = vshll.u32 %v2401_v40, 16  ;;  %v2414_v50 = vld [vmem:[%s2342_s23 + $0x80] sm:$0x1f]   ;;  %v488_v54 = vshrl.u32 %v2261_v34, 16  ;;  %v2267_v14 = vld [vmem:[%s2342_s23 + $0x4c] sm:$0xff]  }
  0x19   : > { %v486_v52 = vrot.slane %v484_v44, 1  ;;  %v2418_v53 = vld [vmem:[%s2342_s23 + $0x20] sm:$0x1f]   ;;  %v922_v55 = vsel %vm459_vm3, %v917_v38, %v921_v35  ;;  %v482_v57 = vor.u32 %v480_v43, %v2409_v47  ;;  %v1254_v58 = vshrl.u32 %v2263_v45, 16  ;;  %v1679_v10 = vld [vmem:[%s2709_s1 + $0x8] sm:$0xf] }
  0x1a   : > { %1881 = vmatmul.mubr.msk.bf16.gmra.mrb[4].mxu1 %vm217_vm2, %v2237_v11  ;;  %v1108_v51 = vor.u32 %v1106_v41, %v2405_v42  ;;  %v2421_v56 = vrot.slane %v1110_v48, 1  ;;  %v492_v60 = vshll.u32 %v2418_v53, 16  ;;  %v1256_v61 = vshll.u32 %v2263_v45, 16  ;;  %v2246_v9 = vld [vmem:[%s2342_s23] sm:$0xff]   ;;  %v2457_v24 = vld [vmem:[%s2342_s23 + $0x54] sm:$0x1f]  }
  0x1b   : > { %1969 = vmatmul.mubr.msk.bf16.gmra.mrb[4].mxu0 %vm217_vm2, %v2238_v12  ;;  %1884 = vmatprep.mubr.msk.bf16.mxu1 %vm2285_vm1, %v2284_v2  ;;  %v490_v59 = vor.u32 %v488_v54, %v486_v52  ;;  %v925_v62 = vor.u32 %v923_v32, %v921_v35  ;;  %v2431_v0 = vsel %vm459_vm3, %v482_v57, %v486_v52  ;;  %v1261_v1 = vshll.u32 %v2264_v49, 16  ;;  %v2465_v32 = vld [vmem:[%s2342_s23 + $0xc] sm:$0xff]   ;;  %v2468_v33 = vld [vmem:[%s2342_s23 + $0x14] sm:$0xff]   ;;  %v1391_v38 = vld [vmem:[%s2342_s23 + $0x4] sm:$0xe] }
  0x1c   : > { %1972 = vmatprep.mubr.msk.bf16.mxu0 %vm2285_vm1, %v2284_v2  ;;  %v2428_v63 = vsel %vm459_vm3, %v1108_v51, %v2421_v56  ;;  %v929_v5 = vrot.slane %v927_v46, 1  ;;  %v2437_v6 = vrot.slane %v492_v60, 1  ;;  %v1258_v7 = vrot.slane %v1256_v61, 1  ;;  %v1041_v48 = vld [vmem:[%s2342_s23 + $0x4] sm:$0xf]  ;;  %v2248_v54 = vld [vmem:[%s2342_s23 + $0x8] sm:$0xff]  }
  0x1d   : > { %v1265_v8 = vshrl.u32 %v2264_v49, 16  ;;  %v931_v11 = vshrl.u32 %v2385_v30, 16  ;;  %v1263_v12 = vrot.slane %v1261_v1, 1  ;;  %v1269_v13 = vshll.u32 %v2265_v4, 16  ;;  %v2250_v1 = vld [vmem:[%s2342_s23 + $0x10] sm:$0xff]  }
  0x1e   : > { %v935_v15 = vshll.u32 %v2414_v50, 16  ;;  %v1273_v18 = vshrl.u32 %v2265_v4, 16  ;;  %v1277_v21 = vshll.u32 %v2267_v14, 16  ;;  %v930_v22 = vsel %vm459_vm3, %v925_v62, %v929_v5 }
  0x1f   : > { %v1267_v19 = vor.u32 %v1265_v8, %v1263_v12  ;;  %v1271_v20 = vrot.slane %v1269_v13, 1  ;;  %v515_v30 = vsel %vm233_vm0, %v1679_v10, 0  ;;  %v1285_v34 = vshll.u32 %v2457_v24, 16  ;;  %v2251_v10 = vld [vmem:[%s2342_s23 + $0x18] sm:$0xff]  }
  0x20   : > { %v1279_v28 = vrot.slane %v1277_v21, 1  ;;  %v937_v35 = vrot.slane %v935_v15, 1  ;;  %v1399_v43 = vrot.slane %v2465_v32, 1  ;;  %v1401_v44 = vrot.slane %v2468_v33, 1 }
  0x21   : > { %v2461_v26 = vsel %vm459_vm3, %v1267_v19, %v1271_v20  ;;  %v2479_v39 = vrot.slane %v1285_v34, 1  ;;  %v933_v45 = vor.u32 %v931_v11, %v929_v5  ;;  %v1403_v46 = vrot.slane %v2388_v31, 1  ;;  %v1772_v11 = vld [vmem:[%s2709_s1 + $0x1c] sm:$0xf] }
  0x22   : > { %1885 = vmatmul.mubr.msk.bf16.gmra.mrb[8].mxu1 %vm217_vm2, %v2239_v16  ;;  %v2450_v16 = vsel %vm459_vm3, %v490_v59, %v2437_v6  ;;  %v2492_v52 = vsel %vm1397_vm4, %v1399_v43, %v1401_v44  ;;  %v1405_v57 = vrot.slane %v2401_v40, 1  ;;  %v939_v61 = vshrl.u32 %v2414_v50, 16 }
  0x23   : > { %1973 = vmatmul.mubr.msk.bf16.gmra.mrb[8].mxu0 %vm217_vm2, %v2240_v17  ;;  %1888 = vmatprep.mubr.msk.bf16.mxu1 %vm2285_vm1, %v2284_v2  ;;  %v1259_v17 = vor.u32 %v1258_v7, %v1254_v58  ;;  %v938_v31 = vsel %vm459_vm3, %v933_v45, %v937_v35  ;;  %v1086_v8 = vshll.u32 %v2465_v32, 16  ;;  %v1094_v15 = vshll.u32 %v2468_v33, 16 }
  0x24   : > { %1986 = vmatprep.mubr.msk.bf16.mxu0 %vm2285_vm1, %v2284_v2  ;;  %v2503_v60 = vsel %vm1397_vm4, %v1403_v46, %v1405_v57  ;;  %v941_v4 = vor.u32 %v939_v61, %v937_v35 }
  0x25   : > { %v2454_v23 = vsel %vm459_vm3, %v1259_v17, %v1263_v12  ;;  %v2256_v12 = vld [vmem:[%s2342_s23] sm:$0xff]   ;;  %v1308_v17 = vsel %vm233_vm0, %v1772_v11, 0  ;;  %v1096_v21 = vrot.slane %v1094_v15, 1 }
  0x26   : > { %v463_v19 = vshll.u32 %v2256_v12, 16 }
  0x2a   : > { %1889 = vmatmul.mubr.msk.bf16.gmra.mrb[12].mxu1 %vm217_vm2, %v2241_v25  ;;  %v1042_v25 = vld [vmem:[%s2342_s23 + $0x8] sm:$0xf] }
  0x2b   : > { %1987 = vmatmul.mubr.msk.bf16.vlgmr.msra.gmra.mrb[0].mxu0 %vm217_vm2, %v914_v27  ;;  %1892 = vmatprep.mubr.msk.bf16.mxu1 %vm2285_vm1, %v2284_v2  ;;  %v1275_v27 = vor.u32 %v1273_v18, %v1271_v20  ;;  %v1784_v41 = vcombine.low %v1391_v38, %v1042_v25  ;;  %v1752_v59 = vcombine.low %v1041_v48, %v1042_v25  ;;  %v2257_v18 = vld [vmem:[%s2342_s23 + $0x8] sm:$0xff]   ;;  %v461_v25 = vshrl.u32 %v2256_v12, 16 }
  0x2c   : > { %2007 = vmatpush3.bf16.msra.mxu0 %v1133_v29  ;;  %1990 = vmatprep.mubr.msk.bf16.mxu0 %vm2285_vm1, %v2284_v2  ;;  %v1281_v29 = vshrl.u32 %v2267_v14, 16  ;;  %v1090_v14 = vshrl.u32 %v2465_v32, 16 }
  0x2d   : > { %2028 = vmatprep.subr.bf16.mxu0 %v2284_v2  ;;  %v2473_v36 = vsel %vm459_vm3, %v1275_v27, %v1279_v28  ;;  %v1398_v51 = vrot.slane %v1784_v41, 1  ;;  %v1081_v62 = vshll.u32 %v1752_v59, 16  ;;  %v1079_v5 = vshrl.u32 %v1752_v59, 16 }
  0x2e   : > { %v465_v27 = vrot.slane %v463_v19, 1 }
  0x2f   : > { %v2498_v58 = vsel %vm1397_vm4, %v1398_v51, %v1399_v43  ;;  %v1083_v7 = vrot.slane %v1081_v62, 1 }
  0x30   : > { %v466_v32 = vor.u32 %v465_v27, %v461_v25 }
  0x31   : > { %v1084_v50 = vor.u32 %v1083_v7, %v1079_v5 }
  0x32   : > { %1893 = vmatmul.mubr.msk.bf16.gmra.mrb[16].mxu1 %vm217_vm2, %v2244_v37  ;;  %v1283_v37 = vor.u32 %v1281_v29, %v1279_v28  ;;  %v468_v28 = vshll.u32 %v2257_v18, 16 }
  0x33   : > { %1991 = vmatmul.mubr.msk.bf16.gmra.mrb[4].mxu0 %vm217_vm2, %v922_v55  ;;  %1898 = vmatprep.mubr.msk.bf16.mxu1 %vm2285_vm1, %v2284_v2  ;;  %v2495_v55 = vsel %vm1397_vm4, %v1401_v44, %v1403_v46 }
  0x34   : > { %1994 = vmatprep.mubr.msk.bf16.mxu0 %vm2285_vm1, %v2284_v2  ;;  %v2490_v49 = vsel %vm459_vm3, %v1283_v37, %v2479_v39  ;;  %v470_v34 = vrot.slane %v468_v28, 1  ;;  %v1699_v37 = vld [vmem:[%s2709_s1 + $0xc] sm:$0xf] }
  0x35   : > { %v649_v43 = vsel %vm233_vm0, %v1699_v37, 0 }
  0x36   : > { %v471_v38 = vsel %vm459_vm3, %v466_v32, %v470_v34 }
  0x3a   : > { %1899 = vmatmul.mubr.msk.bf16.vlgmr.msra.gmra.mrb[0].mxu1 %vm217_vm2, %v2246_v9  ;;  %v1088_v9 = vrot.slane %v1086_v8, 1 }
  0x3b   : > { %1995 = vmatmul.mubr.msk.bf16.gmra.mrb[8].mxu0 %vm217_vm2, %v930_v22  ;;  %1902 = vmatprep.mubr.msk.bf16.mxu1 %vm2285_vm1, %v2284_v2  ;;  %v2254_v22 = vld [vmem:[%s2342_s23 + $0x20] ss:$0 sps:$4 sm:$0xff]  }
  0x3c   : > { %1998 = vmatprep.mubr.msk.bf16.mxu0 %vm2285_vm1, %v2284_v2  ;;  %1919 = vmatpush3.bf16.msra.mxu1 %v515_v30  ;;  %v1089_v13 = vsel %vm459_vm3, %v1084_v50, %v1088_v9  ;;  %v1092_v20 = vor.u32 %v1090_v14, %v1088_v9  ;;  %v1098_v30 = vshrl.u32 %v2468_v33, 16  ;;  %v472_v33 = vshrl.u32 %v2257_v18, 16 }
  0x3d   : > { %1940 = vmatprep.subr.bf16.mxu1 %v2284_v2 }
  0x3e   : > { %v1097_v29 = vsel %vm459_vm3, %v1092_v20, %v1096_v21  ;;  %v1100_v35 = vor.u32 %v1098_v30, %v1096_v21  ;;  %v474_v44 = vor.u32 %v472_v33, %v470_v34 }
  0x40   : > { %v1105_v41 = vsel %vm459_vm3, %v1100_v35, %v2405_v42  ;;  %v479_v45 = vsel %vm459_vm3, %v474_v44, %v2409_v47  ;;  %v1114_v42 = vshrl.u32 %v2401_v40, 16  ;;  %v1783_v47 = vld [vmem:[%s2709_s1 + $0x20] sm:$0xf] }
  0x41   : > { %v2662_v40 = vld [vmem:[%s2710_s2] ss:$0 sm:$0xff] }
  0x42   : > { %1903 = vmatmul.mubr.msk.bf16.gmra.mrb[4].mxu1 %vm217_vm2, %v2248_v54  ;;  %v1116_v46 = vor.u32 %v1114_v42, %v2421_v56  ;;  %v496_v56 = vshrl.u32 %v2418_v53, 16  ;;  %v2266_v53 = vld [vmem:[%s2342_s23 + $0x60] sm:$0xff]  }
  0x43   : > { %1999 = vmatmul.mubr.msk.bf16.gmra.mrb[12].mxu0 %vm217_vm2, %v938_v31  ;;  %1906 = vmatprep.mubr.msk.bf16.mxu1 %vm2285_vm1, %v2284_v2 }
  0x44   : > { %2002 = vmatprep.mubr.msk.bf16.mxu0 %vm2285_vm1, %v2284_v2 }
  0x4a   : > { %1907 = vmatmul.mubr.msk.bf16.gmra.mrb[8].mxu1 %vm217_vm2, %v2250_v1 }
  0x4b   : > { %2003 = vmatmul.mubr.msk.bf16.gmra.mrb[16].mxu0 %vm217_vm2, %v941_v4  ;;  %1910 = vmatprep.mubr.msk.bf16.mxu1 %vm2285_vm1, %v2284_v2 }
  0x4c   : > { %2008 = vmatprep.mubr.msk.bf16.mxu0 %vm2285_vm1, %v2284_v2 }
  0x52   : > { %1911 = vmatmul.mubr.msk.bf16.gmra.mrb[12].mxu1 %vm217_vm2, %v2251_v10 }
  0x53   : > { %2009 = vmatmul.mubr.msk.bf16.vlgmr.msra.gmra.mrb[0].mxu0 %vm217_vm2, %v1089_v13  ;;  %1914 = vmatprep.mubr.msk.bf16.mxu1 %vm2285_vm1, %v2284_v2 }
  0x54   : > { %2029 = vmatpush3.bf16.msra.mxu0 %v1308_v17  ;;  %2012 = vmatprep.mubr.msk.bf16.mxu0 %vm2285_vm1, %v2284_v2 }
  0x55   : > { %2050 = vmatprep.subr.bf16.mxu0 %v2284_v2 }
  0x5a   : > { %1915 = vmatmul.mubr.msk.bf16.gmra.mrb[16].mxu1 %vm217_vm2, %v2254_v22 }
  0x5b   : > { %2013 = vmatmul.mubr.msk.bf16.gmra.mrb[4].mxu0 %vm217_vm2, %v1097_v29  ;;  %1920 = vmatprep.mubr.msk.bf16.mxu1 %vm2285_vm1, %v2284_v2 }
  0x5c   : > { %2016 = vmatprep.mubr.msk.bf16.mxu0 %vm2285_vm1, %v2284_v2 }
  0x62   : > { %1921 = vmatmul.mubr.msk.bf16.vlgmr.msra.gmra.mrb[0].mxu1 %vm217_vm2, %v471_v38 }
  0x63   : > { %2017 = vmatmul.mubr.msk.bf16.gmra.mrb[8].mxu0 %vm217_vm2, %v1105_v41  ;;  %1924 = vmatprep.mubr.msk.bf16.mxu1 %vm2285_vm1, %v2284_v2 }
  0x64   : > { %2020 = vmatprep.mubr.msk.bf16.mxu0 %vm2285_vm1, %v2284_v2  ;;  %1941 = vmatpush3.bf16.msra.mxu1 %v649_v43 }
  0x65   : > { %2072 = vmatprep.subr.bf16.mxu1 %v2284_v2 }
  0x6a   : > { %1925 = vmatmul.mubr.msk.bf16.gmra.mrb[4].mxu1 %vm217_vm2, %v479_v45 }
  0x6b   : > { %2021 = vmatmul.mubr.msk.bf16.gmra.mrb[12].mxu0 %vm217_vm2, %v2428_v63  ;;  %1928 = vmatprep.mubr.msk.bf16.mxu1 %vm2285_vm1, %v2284_v2  ;;  %v1423_v63 = vsel %vm233_vm0, %v1783_v47, 0 }
  0x6c   : > { %2024 = vmatprep.mubr.msk.bf16.mxu0 %vm2285_vm1, %v2284_v2 }
  0x72   : > { %1929 = vmatmul.mubr.msk.bf16.gmra.mrb[8].mxu1 %vm217_vm2, %v2431_v0  ;;  %v498_v0 = vor.u32 %v496_v56, %v2437_v6  ;;  %v2268_v6 = vld [vmem:[%s2342_s23 + $0x68] sm:$0xff]  }
  0x73   : > { %2025 = vmatmul.mubr.msk.bf16.gmra.mrb[16].mxu0 %vm217_vm2, %v1116_v46  ;;  %1932 = vmatprep.mubr.msk.bf16.mxu1 %vm2285_vm1, %v2284_v2 }
  0x74   : > { %2030 = vmatprep.mubr.msk.bf16.mxu0 %vm2285_vm1, %v2284_v2 }
  0x7a   : > { %1933 = vmatmul.mubr.msk.bf16.gmra.mrb[12].mxu1 %vm217_vm2, %v2450_v16  ;;  %v1289_v16 = vshrl.u32 %v2457_v24, 16  ;;  %v2273_v24 = vld [vmem:[%s2342_s23 + $0x80] ss:$0 sps:$4 sm:$0xff]  }
  0x7b   : > { %2031 = vmatmul.mubr.msk.bf16.vlgmr.msra.gmra.mrb[0].mxu0 %vm217_vm2, %v2454_v23  ;;  %1936 = vmatprep.mubr.msk.bf16.mxu1 %vm2285_vm1, %v2284_v2  ;;  %v2270_v23 = vld [vmem:[%s2342_s23 + $0x70] sm:$0xff]  }
  0x7c   : > { %2051 = vmatpush3.bf16.msra.mxu0 %v1423_v63  ;;  %2034 = vmatprep.mubr.msk.bf16.mxu0 %vm2285_vm1, %v2284_v2 }
  0x82   : > { %1937 = vmatmul.mubr.msk.bf16.gmra.mrb[16].mxu1 %vm217_vm2, %v498_v0 }
  0x83   : > { %2035 = vmatmul.mubr.msk.bf16.gmra.mrb[4].mxu0 %vm217_vm2, %v2461_v26  ;;  %1942 = vmatprep.mubr.msk.bf16.mxu1 %vm2285_vm1, %v2284_v2  ;;  %v1291_v26 = vor.u32 %v1289_v16, %v2479_v39  ;;  %v2275_v39 = vld [vmem:[%s2342_s23 + $0xb0] ss:$0 sps:$4 sm:$0xff]  }
  0x84   : > { %2038 = vmatprep.mubr.msk.bf16.mxu0 %vm2285_vm1, %v2284_v2 }
  0x8a   : > { %1943 = vmatmul.mubr.msk.bf16.vlgmr.msra.gmra.mrb[0].mxu1 %vm217_vm2, %v2266_v53 }
  0x8b   : > { %2039 = vmatmul.mubr.msk.bf16.gmra.mrb[8].mxu0 %vm217_vm2, %v2473_v36  ;;  %1946 = vmatprep.mubr.msk.bf16.mxu1 %vm2285_vm1, %v2284_v2  ;;  %v2274_v36 = vld [vmem:[%s2342_s23 + $0xa8] sm:$0xff]  }
  0x8c   : > { %2042 = vmatprep.mubr.msk.bf16.mxu0 %vm2285_vm1, %v2284_v2  ;;  %2073 = vmatpush3.bf16.msra.mxu1 %v2323_v3  ;;  %v2271_v3 = vld [vmem:[%s2342_s23 + $0x78] sm:$0xff]  }
  0x92   : > { %1947 = vmatmul.mubr.msk.bf16.gmra.mrb[4].mxu1 %vm217_vm2, %v2268_v6 }
  0x93   : > { %2043 = vmatmul.mubr.msk.bf16.gmra.mrb[12].mxu0 %vm217_vm2, %v2490_v49  ;;  %1950 = vmatprep.mubr.msk.bf16.mxu1 %vm2285_vm1, %v2284_v2 }
  0x94   : > { %2046 = vmatprep.mubr.msk.bf16.mxu0 %vm2285_vm1, %v2284_v2 }
  0x9a   : > { %1951 = vmatmul.mubr.msk.bf16.gmra.mrb[8].mxu1 %vm217_vm2, %v2270_v23 }
  0x9b   : > { %2047 = vmatmul.mubr.msk.bf16.gmra.mrb[16].mxu0 %vm217_vm2, %v1291_v26  ;;  %1954 = vmatprep.mubr.msk.bf16.mxu1 %vm2285_vm1, %v2284_v2 }
  0x9c   : > { %2052 = vmatprep.mubr.msk.bf16.mxu0 %vm2285_vm1, %v2284_v2 }
  0xa2   : > { %1955 = vmatmul.mubr.msk.bf16.gmra.mrb[12].mxu1 %vm217_vm2, %v2271_v3 }
  0xa3   : > { %2053 = vmatmul.mubr.msk.bf16.vlgmr.msra.gmra.mrb[0].mxu0 %vm217_vm2, %v2498_v58  ;;  %1958 = vmatprep.mubr.msk.bf16.mxu1 %vm2285_vm1, %v2284_v2 }
  0xa4   : > { %2056 = vmatprep.mubr.msk.bf16.mxu0 %vm2285_vm1, %v2284_v2 }
  0xaa   : > { %1959 = vmatmul.mubr.msk.bf16.gmra.mrb[16].mxu1 %vm217_vm2, %v2273_v24 }
  0xab   : > { %2057 = vmatmul.mubr.msk.bf16.gmra.mrb[4].mxu0 %vm217_vm2, %v2492_v52  ;;  %1976 = vmatprep.mubr.msk.bf16.mxu1 %vm2285_vm1, %v2284_v2 }
  0xac   : > { %2060 = vmatprep.mubr.msk.bf16.mxu0 %vm2285_vm1, %v2284_v2 }
  0xb2   : > { %1977 = vmatmul.mubr.msk.bf16.vlgmr.msra.gmra.mrb[12].mxu1 %vm217_vm2, %v2274_v36 }
  0xb3   : > { %2061 = vmatmul.mubr.msk.bf16.gmra.mrb[8].mxu0 %vm217_vm2, %v2495_v55  ;;  %1980 = vmatprep.mubr.msk.bf16.mxu1 %vm2285_vm1, %v2284_v2 }
  0xb4   : > { %2064 = vmatprep.mubr.msk.bf16.mxu0 %vm2285_vm1, %v2284_v2 }
  0xba   : > { %1981 = vmatmul.mubr.msk.bf16.gmra.mrb[16].mxu1 %vm217_vm2, %v2275_v39 }
  0xbb   : > { %2065 = vmatmul.mubr.msk.bf16.gmra.mrb[12].mxu0 %vm217_vm2, %v2503_v60 }
  0xbc   : > { %2068 = vmatprep.mubr.msk.bf16.mxu0 %vm2285_vm1, %v2284_v2 }
  0xc3   : > { %2069 = vmatmul.mubr.msk.bf16.gmra.mrb[16].mxu0 %vm217_vm2, %v1405_v57 }
 0x15d   : > { %v685_v48 = vpop.f32.mrb[0].mxu1 }
 0x15e   : > { %v1944_v49 = vpop.f32.mrb[1].mxu1 }
 0x15f   : > { %v688_v51 = vpop.f32.mrb[2].mxu1 }
 0x160   : > { %v1945_v52 = vpop.f32.mrb[3].mxu1 }
 0x165   : > { %v693_v54 = vpop.f32.mrb[4].mxu1 }
 0x166   : > { %v1948_v55 = vpop.f32.mrb[5].mxu1 }
 0x167   : > { %v696_v58 = vpop.f32.mrb[6].mxu1 }
 0x168   : > { %v1949_v31 = vpop.f32.mrb[7].mxu1 }
 0x16d   : > { %v701_v59 = vpop.f32.mrb[8].mxu1 }
 0x16e   : > { %v1952_v61 = vpop.f32.mrb[9].mxu1 }
 0x16f   : > { %v704_v62 = vpop.f32.mrb[10].mxu1 }
 0x170   : > { %v1953_v1 = vpop.f32.mrb[11].mxu1 }
 0x176   : > { %v1459_v60 = vpop.f32.mrb[0].mxu0 }
 0x177   : > { %v2074_v57 = vadd.f32 %v1459_v60, %v685_v48  ;;  %v2054_v4 = vpop.f32.mrb[1].mxu0 }
 0x178   : > { %v1462_v5 = vpop.f32.mrb[2].mxu0 }
 0x179   : > { %vm1513_vm5 = vcmp.gt.f32.partialorder %v2074_v57, %v2662_v40  ;;  %v2075_v7 = vadd.f32 %v1462_v5, %v688_v51  ;;  %v2055_v8 = vpop.f32.mrb[3].mxu0 }
 0x17a   : > { %v1791_v50 = vsel %vm1513_vm5, 1.0, %v2284_v2 }
 0x17b   : > { %v1811_v9 = vpack.c.bf16 %v1791_v50, %v1791_v50  ;;  %vm1514_vm7 = vcmp.gt.f32.partialorder %v2075_v7, %v2662_v40 }
 0x17c   : > { %v1792_v10 = vsel %vm1514_vm7, 1.0, %v2284_v2 }
 0x17d   : > { %1578 = vst.msk [vmem:[%s2668_s16] sm:$0xf] %vm1577_vm6, %v1811_v9  ;;  %v1812_v11 = vpack.c.bf16 %v1792_v10, %v1792_v10 }
 0x17e   : > { %v1467_v12 = vpop.f32.mrb[4].mxu0 }
 0x17f   : > { %1579 = vst.msk [vmem:[%s2668_s16 + $0x4] sm:$0xf] %vm1577_vm6, %v1812_v11  ;;  %v2076_v13 = vadd.f32 %v1467_v12, %v693_v54  ;;  %v2058_v14 = vpop.f32.mrb[5].mxu0 }
 0x180   : > { %v1470_v15 = vpop.f32.mrb[6].mxu0 }
 0x181   : > { %vm1515_vm8 = vcmp.gt.f32.partialorder %v2076_v13, %v2662_v40  ;;  %v2077_v17 = vadd.f32 %v1470_v15, %v696_v58  ;;  %v2059_v18 = vpop.f32.mrb[7].mxu0 }
 0x182   : > { %v1793_v19 = vsel %vm1515_vm8, 1.0, %v2284_v2 }
 0x183   : > { %v1813_v20 = vpack.c.bf16 %v1793_v19, %v1793_v19  ;;  %vm1516_vm9 = vcmp.gt.f32.partialorder %v2077_v17, %v2662_v40 }
 0x184   : > { %v1794_v21 = vsel %vm1516_vm9, 1.0, %v2284_v2 }
 0x185   : > { %1580 = vst.msk [vmem:[%s2668_s16 + $0x8] sm:$0xf] %vm1577_vm6, %v1813_v20  ;;  %v1814_v22 = vpack.c.bf16 %v1794_v21, %v1794_v21  ;;  %v843_v25 = vpop.f32.mrb[12].mxu1 }
 0x186   : > { %v1475_v27 = vpop.f32.mrb[8].mxu0  ;;  %v1978_v28 = vpop.f32.mrb[13].mxu1 }
 0x187   : > { %1581 = vst.msk [vmem:[%s2668_s16 + $0xc] sm:$0xf] %vm1577_vm6, %v1814_v22  ;;  %v2078_v29 = vadd.f32 %v1475_v27, %v701_v59  ;;  %v2062_v30 = vpop.f32.mrb[9].mxu0  ;;  %v846_v32 = vpop.f32.mrb[14].mxu1 }
 0x188   : > { %v1478_v34 = vpop.f32.mrb[10].mxu0  ;;  %v1979_v35 = vpop.f32.mrb[15].mxu1 }
 0x189   : > { %vm1517_vm10 = vcmp.gt.f32.partialorder %v2078_v29, %v2662_v40  ;;  %v2079_v37 = vadd.f32 %v1478_v34, %v704_v62  ;;  %v2063_v38 = vpop.f32.mrb[11].mxu0 }
 0x18a   : > { %v1795_v33 = vsel %vm1517_vm10, 1.0, %v2284_v2 }
 0x18b   : > { %v1815_v41 = vpack.c.bf16 %v1795_v33, %v1795_v33  ;;  %vm1518_vm11 = vcmp.gt.f32.partialorder %v2079_v37, %v2662_v40 }
 0x18c   : > { %v1796_v43 = vsel %vm1518_vm11, 1.0, %v2284_v2 }
 0x18d   : > { %1582 = vst.msk [vmem:[%s2668_s16 + $0x10] sm:$0xf] %vm1577_vm6, %v1815_v41  ;;  %v1816_v44 = vpack.c.bf16 %v1796_v43, %v1796_v43  ;;  %v851_v45 = vpop.f32.mrb[16].mxu1 }
 0x18e   : > { %v1483_v42 = vpop.f32.mrb[12].mxu0  ;;  %v1982_v46 = vpop.f32.mrb[17].mxu1 }
 0x18f   : > { %1583 = vst.msk [vmem:[%s2668_s16 + $0x14] sm:$0xf] %vm1577_vm6, %v1816_v44  ;;  %v2080_v47 = vadd.f32 %v1483_v42, %v843_v25  ;;  %v2066_v63 = vpop.f32.mrb[13].mxu0  ;;  %v854_v56 = vpop.f32.mrb[18].mxu1 }
 0x190   : > { %v1486_v0 = vpop.f32.mrb[14].mxu0  ;;  %v1983_v53 = vpop.f32.mrb[19].mxu1 }
 0x191   : > { %vm1519_vm12 = vcmp.gt.f32.partialorder %v2080_v47, %v2662_v40  ;;  %v2081_v6 = vadd.f32 %v1486_v0, %v846_v32  ;;  %v2067_v16 = vpop.f32.mrb[15].mxu0 }
 0x192   : > { %v1797_v23 = vsel %vm1519_vm12, 1.0, %v2284_v2 }
 0x193   : > { %v1817_v26 = vpack.c.bf16 %v1797_v23, %v1797_v23  ;;  %vm1520_vm13 = vcmp.gt.f32.partialorder %v2081_v6, %v2662_v40 }
 0x194   : > { %v1798_v3 = vsel %vm1520_vm13, 1.0, %v2284_v2 }
 0x195   : > { %1584 = vst.msk [vmem:[%s2668_s16 + $0x18] sm:$0xf] %vm1577_vm6, %v1817_v26  ;;  %v1818_v24 = vpack.c.bf16 %v1798_v3, %v1798_v3 }
 0x196   : > { %v1491_v36 = vpop.f32.mrb[16].mxu0 }
 0x197   : > { %1585 = vst.msk [vmem:[%s2668_s16 + $0x1c] sm:$0xf] %vm1577_vm6, %v1818_v24  ;;  %v2082_v39 = vadd.f32 %v1491_v36, %v851_v45  ;;  %v2070_v48 = vpop.f32.mrb[17].mxu0 }
 0x198   : > { %v1494_v49 = vpop.f32.mrb[18].mxu0 }
 0x199   : > { %vm1521_vm14 = vcmp.gt.f32.partialorder %v2082_v39, %v2662_v40  ;;  %v2071_v51 = vpop.f32.mrb[19].mxu0 }
 0x19a   : > { %v1799_v52 = vsel %vm1521_vm14, 1.0, %v2284_v2 }
 0x19b   : > { %v1819_v54 = vpack.c.bf16 %v1799_v52, %v1799_v52 }
 0x19d   : > { %1586 = vst.msk [vmem:[%s2668_s16 + $0x20] sm:$0xf] %vm1577_vm6, %v1819_v54 }
 0x19e PF: > { %s13_s12 = sadd.s32 1, %s2282_s12  }
 0x19f   : > { %p10_p4 = scmp.ge.s32.totalorder %s13_s12, 4  }
 0x1a1   :  { %12 = sbr.rel (!%p10_p4) target bundleno = 1 (0x1), region = 73 }

</bundles_post_ra>
